<compile_context>
chip_gen: v7x
topology: tpu7x:2x2x1
jax: 0.10.0
libtpu: 0.0.40
codegen_flags: <defaults>
</compile_context>

<pallas_src>
import functools
import math

import jax
import jax.numpy as jnp
from jax.experimental import pallas as pl
from jax.experimental.pallas import tpu as pltpu

LANE = 128          # padded width of every feature dim (lane-dense)
GATES = 4 * LANE    # padded LSTM gate width (i, f, g, o blocks, each LANE wide)
NEG_SLOPE = 0.01    # nn.LeakyReLU default
BN_EPS = 1e-5       # nn.BatchNorm1d default


def _sigmoid(x):
    return 1.0 / (1.0 + jnp.exp(-x))


def _leaky_relu(x):
    return jnp.where(x >= 0, x, NEG_SLOPE * x)


def _lstm_classifier_kernel(
        x_ref,                                             # (1, B, LANE)
        wih1, whh1, b1, wih2, whh2, b2, wih3, whh3, b3,    # LSTM stack (padded)
        wf1, bf1, wf2, bf2, wf3, bf3, w4, b4,              # head (BN folded)
        out_ref,                                           # (B, LANE)
        h1, c1, h2, c2, h3, c3):                           # VMEM scratch state
    t = pl.program_id(0)

    @pl.when(t == 0)
    def _():
        h1[...] = jnp.zeros_like(h1); c1[...] = jnp.zeros_like(c1)
        h2[...] = jnp.zeros_like(h2); c2[...] = jnp.zeros_like(c2)
        h3[...] = jnp.zeros_like(h3); c3[...] = jnp.zeros_like(c3)

    def lstm_cell(x, h_ref, c_ref, wih_ref, whh_ref, b_ref):
        gates = (jnp.dot(x, wih_ref[...], preferred_element_type=jnp.float32)
                 + jnp.dot(h_ref[...], whh_ref[...],
                           preferred_element_type=jnp.float32)
                 + b_ref[...])
        i = _sigmoid(gates[:, 0 * LANE:1 * LANE])
        f = _sigmoid(gates[:, 1 * LANE:2 * LANE])
        g = jnp.tanh(gates[:, 2 * LANE:3 * LANE])
        o = _sigmoid(gates[:, 3 * LANE:4 * LANE])
        c = f * c_ref[...] + i * g
        h = o * jnp.tanh(c)
        c_ref[...] = c
        h_ref[...] = h
        return h

    x_t = x_ref[0]                                # (B, LANE)
    # Dropout layers between the LSTMs are identity in eval mode.
    h1_t = lstm_cell(x_t, h1, c1, wih1, whh1, b1)
    h2_t = lstm_cell(h1_t, h2, c2, wih2, whh2, b2)
    h3_t = lstm_cell(h2_t, h3, c3, wih3, whh3, b3)

    @pl.when(t == pl.num_programs(0) - 1)
    def _():
        # ClassificationHead on x[:, -1, :]; BatchNorm folded, Dropout = id.
        z = jnp.dot(h3_t, wf1[...], preferred_element_type=jnp.float32) + bf1[...]
        z = _leaky_relu(z)
        z = jnp.dot(z, wf2[...], preferred_element_type=jnp.float32) + bf2[...]
        z = _leaky_relu(z)
        z = jnp.dot(z, wf3[...], preferred_element_type=jnp.float32) + bf3[...]
        z = _leaky_relu(z)
        z = jnp.dot(z, w4[...], preferred_element_type=jnp.float32) + b4[...]
        out_ref[...] = z.astype(out_ref.dtype)


@jax.jit
def lstm_classifier_forward(x, padded):
    """x: (B, T, F) float32.  Returns logits (B, 1), eval-mode LSTMClassifier."""
    B, T, F = x.shape
    Bp = ((B + 7) // 8) * 8
    # (T, B, F) layout so each grid step's block is (1, Bp, LANE): lane-dense.
    x_p = jnp.zeros((T, Bp, LANE), jnp.float32)
    x_p = x_p.at[:, :B, :F].set(jnp.transpose(x, (1, 0, 2)))

    full = lambda arr: pl.BlockSpec(arr.shape, lambda t: (0, 0))
    weight_order = ("wih1", "whh1", "b1", "wih2", "whh2", "b2",
                    "wih3", "whh3", "b3",
                    "wf1", "bf1", "wf2", "bf2", "wf3", "bf3", "w4", "b4")
    weights = [padded[k] for k in weight_order]

    flops = (12 * Bp * T * LANE * GATES                      # 6 gate matmuls/step
             + 2 * Bp * (LANE * 256 + 256 * 128 + 128 * 128 + 128 * 128))
    transcendentals = Bp * T * 3 * 5 * LANE                  # 3 sigm + 2 tanh/cell
    bytes_accessed = (x_p.size + sum(int(w.size) for w in weights)
                      + Bp * LANE) * 4

    out = pl.pallas_call(
        _lstm_classifier_kernel,
        out_shape=jax.ShapeDtypeStruct((Bp, LANE), jnp.float32),
        grid_spec=pltpu.PrefetchScalarGridSpec(
            num_scalar_prefetch=0,
            grid=(T,),
            in_specs=[pl.BlockSpec((1, Bp, LANE), lambda t: (t, 0, 0))]
                     + [full(w) for w in weights],
            out_specs=pl.BlockSpec((Bp, LANE), lambda t: (0, 0)),
            scratch_shapes=[pltpu.VMEM((Bp, LANE), jnp.float32)] * 6),
        compiler_params=pltpu.CompilerParams(
            dimension_semantics=("arbitrary",)),      # true time recurrence
        cost_estimate=pl.CostEstimate(flops=flops,
                                      transcendentals=transcendentals,
                                      bytes_accessed=bytes_accessed),
    )(x_p, *weights)
    return out[:B, :1]


# ----------------------------- parameter setup -----------------------------

def init_real_params(key, in_features, hidden, out_features):
    """Mirror PyTorch default inits; 'math' layout: y = x @ W + b."""
    ks = iter(jax.random.split(key, 64))

    def lstm(in_dim, h):
        k = 1.0 / math.sqrt(h)
        u = lambda shape: jax.random.uniform(next(ks), shape, jnp.float32, -k, k)
        return dict(wih=u((in_dim, 4 * h)), whh=u((h, 4 * h)),
                    b=u((1, 4 * h)) + u((1, 4 * h)))        # b_ih + b_hh

    def linear_bn(in_dim, out_dim, with_bn=True):
        k = 1.0 / math.sqrt(in_dim)
        w = jax.random.uniform(next(ks), (in_dim, out_dim), jnp.float32, -k, k)
        b = jax.random.uniform(next(ks), (out_dim,), jnp.float32, -k, k)
        p = dict(w=w, b=b)
        if with_bn:
            p["gamma"] = jax.random.uniform(next(ks), (out_dim,), jnp.float32, 0.5, 1.5)
            p["beta"] = jax.random.uniform(next(ks), (out_dim,), jnp.float32, -0.5, 0.5)
            p["mean"] = 0.1 * jax.random.normal(next(ks), (out_dim,), jnp.float32)
            p["var"] = jax.random.uniform(next(ks), (out_dim,), jnp.float32, 0.5, 1.5)
        return p

    return dict(
        lstm1=lstm(in_features, hidden),
        lstm2=lstm(hidden, hidden),
        lstm3=lstm(hidden, out_features),
        head1=linear_bn(out_features, 256),
        head2=linear_bn(256, 128),
        head3=linear_bn(128, 64),
        head4=linear_bn(64, 1, with_bn=False),
    )


def _pad_gate_weight(w, h):
    """(in_dim, 4h) -> (LANE, GATES); each i/f/g/o block padded to LANE cols."""
    in_dim = w.shape[0]
    assert in_dim <= LANE and h <= LANE
    out = jnp.zeros((LANE, GATES), jnp.float32)
    for g in range(4):
        out = out.at[:in_dim, g * LANE:g * LANE + h].set(w[:, g * h:(g + 1) * h])
    return out


def _pad_gate_bias(b, h):
    out = jnp.zeros((1, GATES), jnp.float32)
    for g in range(4):
        out = out.at[:, g * LANE:g * LANE + h].set(b[:, g * h:(g + 1) * h])
    return out


def _fold_bn(p):
    """Fold eval-mode BatchNorm1d into the preceding Linear (exact)."""
    scale = p["gamma"] / jnp.sqrt(p["var"] + BN_EPS)
    w = p["w"] * scale[None, :]
    b = p["b"] * scale + (p["beta"] - p["mean"] * scale)
    return w, b


def _pad2(w, rows, cols):
    out = jnp.zeros((rows, cols), jnp.float32)
    return out.at[:w.shape[0], :w.shape[1]].set(w)


def build_padded_params(real, hidden, out_features):
    p = {}
    p["wih1"] = _pad_gate_weight(real["lstm1"]["wih"], hidden)
    p["whh1"] = _pad_gate_weight(real["lstm1"]["whh"], hidden)
    p["b1"] = _pad_gate_bias(real["lstm1"]["b"], hidden)
    p["wih2"] = _pad_gate_weight(real["lstm2"]["wih"], hidden)
    p["whh2"] = _pad_gate_weight(real["lstm2"]["whh"], hidden)
    p["b2"] = _pad_gate_bias(real["lstm2"]["b"], hidden)
    p["wih3"] = _pad_gate_weight(real["lstm3"]["wih"], out_features)
    p["whh3"] = _pad_gate_weight(real["lstm3"]["whh"], out_features)
    p["b3"] = _pad_gate_bias(real["lstm3"]["b"], out_features)

    w1, b1 = _fold_bn(real["head1"])
    w2, b2 = _fold_bn(real["head2"])
    w3, b3 = _fold_bn(real["head3"])
    p["wf1"] = _pad2(w1, LANE, 256); p["bf1"] = _pad2(b1[None, :], 1, 256)
    p["wf2"] = _pad2(w2, 256, 128);  p["bf2"] = _pad2(b2[None, :], 1, 128)
    p["wf3"] = _pad2(w3, 128, LANE); p["bf3"] = _pad2(b3[None, :], 1, LANE)
    p["w4"] = _pad2(real["head4"]["w"], LANE, LANE)
    p["b4"] = _pad2(real["head4"]["b"][None, :], 1, LANE)
    return p


# ------------------------------ pure-JAX reference ------------------------------

def reference_forward(x, real):
    def run_lstm(seq, p):
        B, T, _ = seq.shape
        h_dim = p["whh"].shape[0]
        h = jnp.zeros((B, h_dim), jnp.float32)
        c = jnp.zeros((B, h_dim), jnp.float32)
        outs = []
        for t in range(T):
            gates = seq[:, t] @ p["wih"] + h @ p["whh"] + p["b"]
            i = jax.nn.sigmoid(gates[:, 0:h_dim])
            f = jax.nn.sigmoid(gates[:, h_dim:2 * h_dim])
            g = jnp.tanh(gates[:, 2 * h_dim:3 * h_dim])
            o = jax.nn.sigmoid(gates[:, 3 * h_dim:4 * h_dim])
            c = f * c + i * g
            h = o * jnp.tanh(c)
            outs.append(h)
        return jnp.stack(outs, axis=1)

    h = run_lstm(x, real["lstm1"])
    h = run_lstm(h, real["lstm2"])
    h = run_lstm(h, real["lstm3"])
    z = h[:, -1, :]
    for name in ("head1", "head2", "head3"):
        p = real[name]
        z = z @ p["w"] + p["b"]
        z = (z - p["mean"]) / jnp.sqrt(p["var"] + BN_EPS) * p["gamma"] + p["beta"]
        z = jnp.where(z >= 0, z, NEG_SLOPE * z)
    p = real["head4"]
    return z @ p["w"] + p["b"]


if __name__ == "__main__":
    # Small shapes consistent with LSTMClassifier defaults (eval mode):
    # batch=8, seq=8, inchannel=16, hidden_features_num=40, out_features_num=80,
    # hidden_num_layers=1, dropout=0.1, activation='none'.
    B, T, F = 8, 8, 16
    HIDDEN, OUT = 40, 80

    root = jax.random.PRNGKey(0)
    k_x, k_p = jax.random.split(root)
    x = jax.random.normal(k_x, (B, T, F), jnp.float32)

    real = init_real_params(k_p, F, HIDDEN, OUT)
    padded = build_padded_params(real, HIDDEN, OUT)

    logits = lstm_classifier_forward(x, padded)
    jax.block_until_ready(logits)

    ref = reference_forward(x, real)
    assert logits.shape == (B, 1)
    err = float(jnp.max(jnp.abs(logits - ref)))
    assert jnp.allclose(logits, ref, atol=1e-4, rtol=1e-4), err

    print("KERNEL_OK")
</pallas_src>

<mosaic_0001>
module attributes {stable_mosaic.version = 11 : i64} {
  func.func @_lstm_classifier_kernel(%arg0: i32, %arg1: memref<1x8x128xf32, #tpu.memory_space<vmem>>, %arg2: memref<128x512xf32, #tpu.memory_space<vmem>>, %arg3: memref<128x512xf32, #tpu.memory_space<vmem>>, %arg4: memref<1x512xf32, #tpu.memory_space<vmem>>, %arg5: memref<128x512xf32, #tpu.memory_space<vmem>>, %arg6: memref<128x512xf32, #tpu.memory_space<vmem>>, %arg7: memref<1x512xf32, #tpu.memory_space<vmem>>, %arg8: memref<128x512xf32, #tpu.memory_space<vmem>>, %arg9: memref<128x512xf32, #tpu.memory_space<vmem>>, %arg10: memref<1x512xf32, #tpu.memory_space<vmem>>, %arg11: memref<128x256xf32, #tpu.memory_space<vmem>>, %arg12: memref<1x256xf32, #tpu.memory_space<vmem>>, %arg13: memref<256x128xf32, #tpu.memory_space<vmem>>, %arg14: memref<1x128xf32, #tpu.memory_space<vmem>>, %arg15: memref<128x128xf32, #tpu.memory_space<vmem>>, %arg16: memref<1x128xf32, #tpu.memory_space<vmem>>, %arg17: memref<128x128xf32, #tpu.memory_space<vmem>>, %arg18: memref<1x128xf32, #tpu.memory_space<vmem>>, %arg19: memref<8x128xf32, #tpu.memory_space<vmem>>, %arg20: memref<8x128xf32, #tpu.memory_space<vmem>>, %arg21: memref<8x128xf32, #tpu.memory_space<vmem>>, %arg22: memref<8x128xf32, #tpu.memory_space<vmem>>, %arg23: memref<8x128xf32, #tpu.memory_space<vmem>>, %arg24: memref<8x128xf32, #tpu.memory_space<vmem>>, %arg25: memref<8x128xf32, #tpu.memory_space<vmem>>) attributes {dimension_semantics = [#tpu.dimension_semantics<arbitrary>], iteration_bounds = array<i64: 8>, scalar_prefetch = 0 : i64, scratch_operands = 6 : i64, tpu.core_type = #tpu.core_type<tc>, window_params = [{transform_indices = @transform_0, window_bounds = array<i64: 1, 8, 128>}, {pipeline_mode = #tpu.pipeline_mode<synchronous>, transform_indices = @transform_1, window_bounds = array<i64: 128, 512>}, {pipeline_mode = #tpu.pipeline_mode<synchronous>, transform_indices = @transform_2, window_bounds = array<i64: 128, 512>}, {pipeline_mode = #tpu.pipeline_mode<synchronous>, transform_indices = @transform_3, window_bounds = array<i64: 1, 512>}, {pipeline_mode = #tpu.pipeline_mode<synchronous>, transform_indices = @transform_4, window_bounds = array<i64: 128, 512>}, {pipeline_mode = #tpu.pipeline_mode<synchronous>, transform_indices = @transform_5, window_bounds = array<i64: 128, 512>}, {pipeline_mode = #tpu.pipeline_mode<synchronous>, transform_indices = @transform_6, window_bounds = array<i64: 1, 512>}, {pipeline_mode = #tpu.pipeline_mode<synchronous>, transform_indices = @transform_7, window_bounds = array<i64: 128, 512>}, {pipeline_mode = #tpu.pipeline_mode<synchronous>, transform_indices = @transform_8, window_bounds = array<i64: 128, 512>}, {pipeline_mode = #tpu.pipeline_mode<synchronous>, transform_indices = @transform_9, window_bounds = array<i64: 1, 512>}, {pipeline_mode = #tpu.pipeline_mode<synchronous>, transform_indices = @transform_10, window_bounds = array<i64: 128, 256>}, {pipeline_mode = #tpu.pipeline_mode<synchronous>, transform_indices = @transform_11, window_bounds = array<i64: 1, 256>}, {pipeline_mode = #tpu.pipeline_mode<synchronous>, transform_indices = @transform_12, window_bounds = array<i64: 256, 128>}, {pipeline_mode = #tpu.pipeline_mode<synchronous>, transform_indices = @transform_13, window_bounds = array<i64: 1, 128>}, {pipeline_mode = #tpu.pipeline_mode<synchronous>, transform_indices = @transform_14, window_bounds = array<i64: 128, 128>}, {pipeline_mode = #tpu.pipeline_mode<synchronous>, transform_indices = @transform_15, window_bounds = array<i64: 1, 128>}, {pipeline_mode = #tpu.pipeline_mode<synchronous>, transform_indices = @transform_16, window_bounds = array<i64: 128, 128>}, {pipeline_mode = #tpu.pipeline_mode<synchronous>, transform_indices = @transform_17, window_bounds = array<i64: 1, 128>}, {pipeline_mode = #tpu.pipeline_mode<synchronous>, transform_indices = @transform_18, window_bounds = array<i64: 8, 128>}]} {
    %c0_i32 = arith.constant 0 : i32
    %0 = arith.cmpi eq, %arg0, %c0_i32 : i32
    %1 = arith.extui %0 : i1 to i32
    %c0_i32_0 = arith.constant 0 : i32
    %2 = arith.cmpi ne, %1, %c0_i32_0 : i32
    scf.if %2 {
      %cst_78 = arith.constant 0.000000e+00 : f32
      %137 = vector.broadcast %cst_78 : f32 to vector<8x128xf32>
      %c0_79 = arith.constant 0 : index
      %c0_80 = arith.constant 0 : index
      %138 = vector.load %arg20[%c0_79, %c0_80] : memref<8x128xf32, #tpu.memory_space<vmem>>, vector<8x128xf32>
      tpu.vector_store %arg20[%c0_79, %c0_80], %137 {strides = array<i32>} : memref<8x128xf32, #tpu.memory_space<vmem>>, vector<8x128xf32>,
      %cst_81 = arith.constant 0.000000e+00 : f32
      %139 = vector.broadcast %cst_81 : f32 to vector<8x128xf32>
      %c0_82 = arith.constant 0 : index
      %c0_83 = arith.constant 0 : index
      %140 = vector.load %arg21[%c0_82, %c0_83] : memref<8x128xf32, #tpu.memory_space<vmem>>, vector<8x128xf32>
      tpu.vector_store %arg21[%c0_82, %c0_83], %139 {strides = array<i32>} : memref<8x128xf32, #tpu.memory_space<vmem>>, vector<8x128xf32>,
      %cst_84 = arith.constant 0.000000e+00 : f32
      %141 = vector.broadcast %cst_84 : f32 to vector<8x128xf32>
      %c0_85 = arith.constant 0 : index
      %c0_86 = arith.constant 0 : index
      %142 = vector.load %arg22[%c0_85, %c0_86] : memref<8x128xf32, #tpu.memory_space<vmem>>, vector<8x128xf32>
      tpu.vector_store %arg22[%c0_85, %c0_86], %141 {strides = array<i32>} : memref<8x128xf32, #tpu.memory_space<vmem>>, vector<8x128xf32>,
      %cst_87 = arith.constant 0.000000e+00 : f32
      %143 = vector.broadcast %cst_87 : f32 to vector<8x128xf32>
      %c0_88 = arith.constant 0 : index
      %c0_89 = arith.constant 0 : index
      %144 = vector.load %arg23[%c0_88, %c0_89] : memref<8x128xf32, #tpu.memory_space<vmem>>, vector<8x128xf32>
      tpu.vector_store %arg23[%c0_88, %c0_89], %143 {strides = array<i32>} : memref<8x128xf32, #tpu.memory_space<vmem>>, vector<8x128xf32>,
      %cst_90 = arith.constant 0.000000e+00 : f32
      %145 = vector.broadcast %cst_90 : f32 to vector<8x128xf32>
      %c0_91 = arith.constant 0 : index
      %c0_92 = arith.constant 0 : index
      %146 = vector.load %arg24[%c0_91, %c0_92] : memref<8x128xf32, #tpu.memory_space<vmem>>, vector<8x128xf32>
      tpu.vector_store %arg24[%c0_91, %c0_92], %145 {strides = array<i32>} : memref<8x128xf32, #tpu.memory_space<vmem>>, vector<8x128xf32>,
      %cst_93 = arith.constant 0.000000e+00 : f32
      %147 = vector.broadcast %cst_93 : f32 to vector<8x128xf32>
      %c0_94 = arith.constant 0 : index
      %c0_95 = arith.constant 0 : index
      %148 = vector.load %arg25[%c0_94, %c0_95] : memref<8x128xf32, #tpu.memory_space<vmem>>, vector<8x128xf32>
      tpu.vector_store %arg25[%c0_94, %c0_95], %147 {strides = array<i32>} : memref<8x128xf32, #tpu.memory_space<vmem>>, vector<8x128xf32>,
    } else {
    }
    %c0 = arith.constant 0 : index
    %c0_1 = arith.constant 0 : index
    %c0_2 = arith.constant 0 : index
    %3 = vector.load %arg1[%c0, %c0_1, %c0_2] : memref<1x8x128xf32, #tpu.memory_space<vmem>>, vector<1x8x128xf32>
    %4 = vector.shape_cast %3 : vector<1x8x128xf32> to vector<8x128xf32>
    %c0_3 = arith.constant 0 : index
    %c0_4 = arith.constant 0 : index
    %5 = vector.load %arg2[%c0_3, %c0_4] : memref<128x512xf32, #tpu.memory_space<vmem>>, vector<128x512xf32>
    %cst = arith.constant dense<0.000000e+00> : vector<8x512xf32>
    %6 = tpu.matmul %4, %5, %cst {dimension_numbers = #tpu.dot_dimension_numbers<[1], [0], [0], [1], [0, 0, 1, 1], [], []>} : vector<8x128xf32>, vector<128x512xf32>, vector<8x512xf32> -> vector<8x512xf32>
    %c0_5 = arith.constant 0 : index
    %c0_6 = arith.constant 0 : index
    %7 = vector.load %arg20[%c0_5, %c0_6] : memref<8x128xf32, #tpu.memory_space<vmem>>, vector<8x128xf32>
    %c0_7 = arith.constant 0 : index
    %c0_8 = arith.constant 0 : index
    %8 = vector.load %arg3[%c0_7, %c0_8] : memref<128x512xf32, #tpu.memory_space<vmem>>, vector<128x512xf32>
    %cst_9 = arith.constant dense<0.000000e+00> : vector<8x512xf32>
    %9 = tpu.matmul %7, %8, %cst_9 {dimension_numbers = #tpu.dot_dimension_numbers<[1], [0], [0], [1], [0, 0, 1, 1], [], []>} : vector<8x128xf32>, vector<128x512xf32>, vector<8x512xf32> -> vector<8x512xf32>
    %10 = arith.addf %6, %9 : vector<8x512xf32>
    %c0_10 = arith.constant 0 : index
    %c0_11 = arith.constant 0 : index
    %11 = vector.load %arg4[%c0_10, %c0_11] : memref<1x512xf32, #tpu.memory_space<vmem>>, vector<1x512xf32>
    %12 = vector.broadcast %11 : vector<1x512xf32> to vector<8x512xf32>
    %13 = arith.addf %10, %12 : vector<8x512xf32>
    %14 = vector.extract_strided_slice %13 {offsets = [0, 0], sizes = [8, 128], strides = [1, 1]} : vector<8x512xf32> to vector<8x128xf32>
    %cst_12 = arith.constant 0.000000e+00 : f32
    %15 = vector.broadcast %cst_12 : f32 to vector<8x128xf32>
    %16 = arith.subf %15, %14 : vector<8x128xf32>
    %17 = math.exp %16 : vector<8x128xf32>
    %cst_13 = arith.constant 1.000000e+00 : f32
    %18 = vector.broadcast %cst_13 : f32 to vector<8x128xf32>
    %19 = arith.addf %18, %17 : vector<8x128xf32>
    %cst_14 = arith.constant 1.000000e+00 : f32
    %20 = vector.broadcast %cst_14 : f32 to vector<8x128xf32>
    %21 = arith.divf %20, %19 : vector<8x128xf32>
    %22 = vector.extract_strided_slice %13 {offsets = [0, 128], sizes = [8, 128], strides = [1, 1]} : vector<8x512xf32> to vector<8x128xf32>
    %cst_15 = arith.constant 0.000000e+00 : f32
    %23 = vector.broadcast %cst_15 : f32 to vector<8x128xf32>
    %24 = arith.subf %23, %22 : vector<8x128xf32>
    %25 = math.exp %24 : vector<8x128xf32>
    %cst_16 = arith.constant 1.000000e+00 : f32
    %26 = vector.broadcast %cst_16 : f32 to vector<8x128xf32>
    %27 = arith.addf %26, %25 : vector<8x128xf32>
    %cst_17 = arith.constant 1.000000e+00 : f32
    %28 = vector.broadcast %cst_17 : f32 to vector<8x128xf32>
    %29 = arith.divf %28, %27 : vector<8x128xf32>
    %30 = vector.extract_strided_slice %13 {offsets = [0, 256], sizes = [8, 128], strides = [1, 1]} : vector<8x512xf32> to vector<8x128xf32>
    %31 = math.tanh %30 : vector<8x128xf32>
    %32 = vector.extract_strided_slice %13 {offsets = [0, 384], sizes = [8, 128], strides = [1, 1]} : vector<8x512xf32> to vector<8x128xf32>
    %cst_18 = arith.constant 0.000000e+00 : f32
    %33 = vector.broadcast %cst_18 : f32 to vector<8x128xf32>
    %34 = arith.subf %33, %32 : vector<8x128xf32>
    %35 = math.exp %34 : vector<8x128xf32>
    %cst_19 = arith.constant 1.000000e+00 : f32
    %36 = vector.broadcast %cst_19 : f32 to vector<8x128xf32>
    %37 = arith.addf %36, %35 : vector<8x128xf32>
    %cst_20 = arith.constant 1.000000e+00 : f32
    %38 = vector.broadcast %cst_20 : f32 to vector<8x128xf32>
    %39 = arith.divf %38, %37 : vector<8x128xf32>
    %c0_21 = arith.constant 0 : index
    %c0_22 = arith.constant 0 : index
    %40 = vector.load %arg21[%c0_21, %c0_22] : memref<8x128xf32, #tpu.memory_space<vmem>>, vector<8x128xf32>
    %41 = arith.mulf %29, %40 : vector<8x128xf32>
    %42 = arith.mulf %21, %31 : vector<8x128xf32>
    %43 = arith.addf %41, %42 : vector<8x128xf32>
    %44 = math.tanh %43 : vector<8x128xf32>
    %45 = arith.mulf %39, %44 : vector<8x128xf32>
    %c0_23 = arith.constant 0 : index
    %c0_24 = arith.constant 0 : index
    %46 = vector.load %arg21[%c0_23, %c0_24] : memref<8x128xf32, #tpu.memory_space<vmem>>, vector<8x128xf32>
    tpu.vector_store %arg21[%c0_23, %c0_24], %43 {strides = array<i32>} : memref<8x128xf32, #tpu.memory_space<vmem>>, vector<8x128xf32>,
    %c0_25 = arith.constant 0 : index
    %c0_26 = arith.constant 0 : index
    %47 = vector.load %arg20[%c0_25, %c0_26] : memref<8x128xf32, #tpu.memory_space<vmem>>, vector<8x128xf32>
    tpu.vector_store %arg20[%c0_25, %c0_26], %45 {strides = array<i32>} : memref<8x128xf32, #tpu.memory_space<vmem>>, vector<8x128xf32>,
    %c0_27 = arith.constant 0 : index
    %c0_28 = arith.constant 0 : index
    %48 = vector.load %arg5[%c0_27, %c0_28] : memref<128x512xf32, #tpu.memory_space<vmem>>, vector<128x512xf32>
    %cst_29 = arith.constant dense<0.000000e+00> : vector<8x512xf32>
    %49 = tpu.matmul %45, %48, %cst_29 {dimension_numbers = #tpu.dot_dimension_numbers<[1], [0], [0], [1], [0, 0, 1, 1], [], []>} : vector<8x128xf32>, vector<128x512xf32>, vector<8x512xf32> -> vector<8x512xf32>
    %c0_30 = arith.constant 0 : index
    %c0_31 = arith.constant 0 : index
    %50 = vector.load %arg22[%c0_30, %c0_31] : memref<8x128xf32, #tpu.memory_space<vmem>>, vector<8x128xf32>
    %c0_32 = arith.constant 0 : index
    %c0_33 = arith.constant 0 : index
    %51 = vector.load %arg6[%c0_32, %c0_33] : memref<128x512xf32, #tpu.memory_space<vmem>>, vector<128x512xf32>
    %cst_34 = arith.constant dense<0.000000e+00> : vector<8x512xf32>
    %52 = tpu.matmul %50, %51, %cst_34 {dimension_numbers = #tpu.dot_dimension_numbers<[1], [0], [0], [1], [0, 0, 1, 1], [], []>} : vector<8x128xf32>, vector<128x512xf32>, vector<8x512xf32> -> vector<8x512xf32>
    %53 = arith.addf %49, %52 : vector<8x512xf32>
    %c0_35 = arith.constant 0 : index
    %c0_36 = arith.constant 0 : index
    %54 = vector.load %arg7[%c0_35, %c0_36] : memref<1x512xf32, #tpu.memory_space<vmem>>, vector<1x512xf32>
    %55 = vector.broadcast %54 : vector<1x512xf32> to vector<8x512xf32>
    %56 = arith.addf %53, %55 : vector<8x512xf32>
    %57 = vector.extract_strided_slice %56 {offsets = [0, 0], sizes = [8, 128], strides = [1, 1]} : vector<8x512xf32> to vector<8x128xf32>
    %cst_37 = arith.constant 0.000000e+00 : f32
    %58 = vector.broadcast %cst_37 : f32 to vector<8x128xf32>
    %59 = arith.subf %58, %57 : vector<8x128xf32>
    %60 = math.exp %59 : vector<8x128xf32>
    %cst_38 = arith.constant 1.000000e+00 : f32
    %61 = vector.broadcast %cst_38 : f32 to vector<8x128xf32>
    %62 = arith.addf %61, %60 : vector<8x128xf32>
    %cst_39 = arith.constant 1.000000e+00 : f32
    %63 = vector.broadcast %cst_39 : f32 to vector<8x128xf32>
    %64 = arith.divf %63, %62 : vector<8x128xf32>
    %65 = vector.extract_strided_slice %56 {offsets = [0, 128], sizes = [8, 128], strides = [1, 1]} : vector<8x512xf32> to vector<8x128xf32>
    %cst_40 = arith.constant 0.000000e+00 : f32
    %66 = vector.broadcast %cst_40 : f32 to vector<8x128xf32>
    %67 = arith.subf %66, %65 : vector<8x128xf32>
    %68 = math.exp %67 : vector<8x128xf32>
    %cst_41 = arith.constant 1.000000e+00 : f32
    %69 = vector.broadcast %cst_41 : f32 to vector<8x128xf32>
    %70 = arith.addf %69, %68 : vector<8x128xf32>
    %cst_42 = arith.constant 1.000000e+00 : f32
    %71 = vector.broadcast %cst_42 : f32 to vector<8x128xf32>
    %72 = arith.divf %71, %70 : vector<8x128xf32>
    %73 = vector.extract_strided_slice %56 {offsets = [0, 256], sizes = [8, 128], strides = [1, 1]} : vector<8x512xf32> to vector<8x128xf32>
    %74 = math.tanh %73 : vector<8x128xf32>
    %75 = vector.extract_strided_slice %56 {offsets = [0, 384], sizes = [8, 128], strides = [1, 1]} : vector<8x512xf32> to vector<8x128xf32>
    %cst_43 = arith.constant 0.000000e+00 : f32
    %76 = vector.broadcast %cst_43 : f32 to vector<8x128xf32>
    %77 = arith.subf %76, %75 : vector<8x128xf32>
    %78 = math.exp %77 : vector<8x128xf32>
    %cst_44 = arith.constant 1.000000e+00 : f32
    %79 = vector.broadcast %cst_44 : f32 to vector<8x128xf32>
    %80 = arith.addf %79, %78 : vector<8x128xf32>
    %cst_45 = arith.constant 1.000000e+00 : f32
    %81 = vector.broadcast %cst_45 : f32 to vector<8x128xf32>
    %82 = arith.divf %81, %80 : vector<8x128xf32>
    %c0_46 = arith.constant 0 : index
    %c0_47 = arith.constant 0 : index
    %83 = vector.load %arg23[%c0_46, %c0_47] : memref<8x128xf32, #tpu.memory_space<vmem>>, vector<8x128xf32>
    %84 = arith.mulf %72, %83 : vector<8x128xf32>
    %85 = arith.mulf %64, %74 : vector<8x128xf32>
    %86 = arith.addf %84, %85 : vector<8x128xf32>
    %87 = math.tanh %86 : vector<8x128xf32>
    %88 = arith.mulf %82, %87 : vector<8x128xf32>
    %c0_48 = arith.constant 0 : index
    %c0_49 = arith.constant 0 : index
    %89 = vector.load %arg23[%c0_48, %c0_49] : memref<8x128xf32, #tpu.memory_space<vmem>>, vector<8x128xf32>
    tpu.vector_store %arg23[%c0_48, %c0_49], %86 {strides = array<i32>} : memref<8x128xf32, #tpu.memory_space<vmem>>, vector<8x128xf32>,
    %c0_50 = arith.constant 0 : index
    %c0_51 = arith.constant 0 : index
    %90 = vector.load %arg22[%c0_50, %c0_51] : memref<8x128xf32, #tpu.memory_space<vmem>>, vector<8x128xf32>
    tpu.vector_store %arg22[%c0_50, %c0_51], %88 {strides = array<i32>} : memref<8x128xf32, #tpu.memory_space<vmem>>, vector<8x128xf32>,
    %c0_52 = arith.constant 0 : index
    %c0_53 = arith.constant 0 : index
    %91 = vector.load %arg8[%c0_52, %c0_53] : memref<128x512xf32, #tpu.memory_space<vmem>>, vector<128x512xf32>
    %cst_54 = arith.constant dense<0.000000e+00> : vector<8x512xf32>
    %92 = tpu.matmul %88, %91, %cst_54 {dimension_numbers = #tpu.dot_dimension_numbers<[1], [0], [0], [1], [0, 0, 1, 1], [], []>} : vector<8x128xf32>, vector<128x512xf32>, vector<8x512xf32> -> vector<8x512xf32>
    %c0_55 = arith.constant 0 : index
    %c0_56 = arith.constant 0 : index
    %93 = vector.load %arg24[%c0_55, %c0_56] : memref<8x128xf32, #tpu.memory_space<vmem>>, vector<8x128xf32>
    %c0_57 = arith.constant 0 : index
    %c0_58 = arith.constant 0 : index
    %94 = vector.load %arg9[%c0_57, %c0_58] : memref<128x512xf32, #tpu.memory_space<vmem>>, vector<128x512xf32>
    %cst_59 = arith.constant dense<0.000000e+00> : vector<8x512xf32>
    %95 = tpu.matmul %93, %94, %cst_59 {dimension_numbers = #tpu.dot_dimension_numbers<[1], [0], [0], [1], [0, 0, 1, 1], [], []>} : vector<8x128xf32>, vector<128x512xf32>, vector<8x512xf32> -> vector<8x512xf32>
    %96 = arith.addf %92, %95 : vector<8x512xf32>
    %c0_60 = arith.constant 0 : index
    %c0_61 = arith.constant 0 : index
    %97 = vector.load %arg10[%c0_60, %c0_61] : memref<1x512xf32, #tpu.memory_space<vmem>>, vector<1x512xf32>
    %98 = vector.broadcast %97 : vector<1x512xf32> to vector<8x512xf32>
    %99 = arith.addf %96, %98 : vector<8x512xf32>
    %100 = vector.extract_strided_slice %99 {offsets = [0, 0], sizes = [8, 128], strides = [1, 1]} : vector<8x512xf32> to vector<8x128xf32>
    %cst_62 = arith.constant 0.000000e+00 : f32
    %101 = vector.broadcast %cst_62 : f32 to vector<8x128xf32>
    %102 = arith.subf %101, %100 : vector<8x128xf32>
    %103 = math.exp %102 : vector<8x128xf32>
    %cst_63 = arith.constant 1.000000e+00 : f32
    %104 = vector.broadcast %cst_63 : f32 to vector<8x128xf32>
    %105 = arith.addf %104, %103 : vector<8x128xf32>
    %cst_64 = arith.constant 1.000000e+00 : f32
    %106 = vector.broadcast %cst_64 : f32 to vector<8x128xf32>
    %107 = arith.divf %106, %105 : vector<8x128xf32>
    %108 = vector.extract_strided_slice %99 {offsets = [0, 128], sizes = [8, 128], strides = [1, 1]} : vector<8x512xf32> to vector<8x128xf32>
    %cst_65 = arith.constant 0.000000e+00 : f32
    %109 = vector.broadcast %cst_65 : f32 to vector<8x128xf32>
    %110 = arith.subf %109, %108 : vector<8x128xf32>
    %111 = math.exp %110 : vector<8x128xf32>
    %cst_66 = arith.constant 1.000000e+00 : f32
    %112 = vector.broadcast %cst_66 : f32 to vector<8x128xf32>
    %113 = arith.addf %112, %111 : vector<8x128xf32>
    %cst_67 = arith.constant 1.000000e+00 : f32
    %114 = vector.broadcast %cst_67 : f32 to vector<8x128xf32>
    %115 = arith.divf %114, %113 : vector<8x128xf32>
    %116 = vector.extract_strided_slice %99 {offsets = [0, 256], sizes = [8, 128], strides = [1, 1]} : vector<8x512xf32> to vector<8x128xf32>
    %117 = math.tanh %116 : vector<8x128xf32>
    %118 = vector.extract_strided_slice %99 {offsets = [0, 384], sizes = [8, 128], strides = [1, 1]} : vector<8x512xf32> to vector<8x128xf32>
    %cst_68 = arith.constant 0.000000e+00 : f32
    %119 = vector.broadcast %cst_68 : f32 to vector<8x128xf32>
    %120 = arith.subf %119, %118 : vector<8x128xf32>
    %121 = math.exp %120 : vector<8x128xf32>
    %cst_69 = arith.constant 1.000000e+00 : f32
    %122 = vector.broadcast %cst_69 : f32 to vector<8x128xf32>
    %123 = arith.addf %122, %121 : vector<8x128xf32>
    %cst_70 = arith.constant 1.000000e+00 : f32
    %124 = vector.broadcast %cst_70 : f32 to vector<8x128xf32>
    %125 = arith.divf %124, %123 : vector<8x128xf32>
    %c0_71 = arith.constant 0 : index
    %c0_72 = arith.constant 0 : index
    %126 = vector.load %arg25[%c0_71, %c0_72] : memref<8x128xf32, #tpu.memory_space<vmem>>, vector<8x128xf32>
    %127 = arith.mulf %115, %126 : vector<8x128xf32>
    %128 = arith.mulf %107, %117 : vector<8x128xf32>
    %129 = arith.addf %127, %128 : vector<8x128xf32>
    %130 = math.tanh %129 : vector<8x128xf32>
    %131 = arith.mulf %125, %130 : vector<8x128xf32>
    %c0_73 = arith.constant 0 : index
    %c0_74 = arith.constant 0 : index
    %132 = vector.load %arg25[%c0_73, %c0_74] : memref<8x128xf32, #tpu.memory_space<vmem>>, vector<8x128xf32>
    tpu.vector_store %arg25[%c0_73, %c0_74], %129 {strides = array<i32>} : memref<8x128xf32, #tpu.memory_space<vmem>>, vector<8x128xf32>,
    %c0_75 = arith.constant 0 : index
    %c0_76 = arith.constant 0 : index
    %133 = vector.load %arg24[%c0_75, %c0_76] : memref<8x128xf32, #tpu.memory_space<vmem>>, vector<8x128xf32>
    tpu.vector_store %arg24[%c0_75, %c0_76], %131 {strides = array<i32>} : memref<8x128xf32, #tpu.memory_space<vmem>>, vector<8x128xf32>,
    %c7_i32 = arith.constant 7 : i32
    %134 = arith.cmpi eq, %arg0, %c7_i32 : i32
    %135 = arith.extui %134 : i1 to i32
    %c0_i32_77 = arith.constant 0 : i32
    %136 = arith.cmpi ne, %135, %c0_i32_77 : i32
    scf.if %136 {
      %c0_78 = arith.constant 0 : index
      %c0_79 = arith.constant 0 : index
      %137 = vector.load %arg11[%c0_78, %c0_79] : memref<128x256xf32, #tpu.memory_space<vmem>>, vector<128x256xf32>
      %cst_80 = arith.constant dense<0.000000e+00> : vector<8x256xf32>
      %138 = tpu.matmul %131, %137, %cst_80 {dimension_numbers = #tpu.dot_dimension_numbers<[1], [0], [0], [1], [0, 0, 1, 1], [], []>} : vector<8x128xf32>, vector<128x256xf32>, vector<8x256xf32> -> vector<8x256xf32>
      %c0_81 = arith.constant 0 : index
      %c0_82 = arith.constant 0 : index
      %139 = vector.load %arg12[%c0_81, %c0_82] : memref<1x256xf32, #tpu.memory_space<vmem>>, vector<1x256xf32>
      %140 = vector.broadcast %139 : vector<1x256xf32> to vector<8x256xf32>
      %141 = arith.addf %138, %140 : vector<8x256xf32>
      %cst_83 = arith.constant 0.000000e+00 : f32
      %142 = vector.broadcast %cst_83 : f32 to vector<8x256xf32>
      %143 = arith.cmpf oge, %141, %142 : vector<8x256xf32>
      %cst_84 = arith.constant 0.00999999977 : f32
      %144 = vector.broadcast %cst_84 : f32 to vector<8x256xf32>
      %145 = arith.mulf %144, %141 : vector<8x256xf32>
      %146 = arith.select %143, %141, %145 : vector<8x256xi1>, vector<8x256xf32>
      %c0_85 = arith.constant 0 : index
      %c0_86 = arith.constant 0 : index
      %147 = vector.load %arg13[%c0_85, %c0_86] : memref<256x128xf32, #tpu.memory_space<vmem>>, vector<256x128xf32>
      %cst_87 = arith.constant dense<0.000000e+00> : vector<8x128xf32>
      %148 = tpu.matmul %146, %147, %cst_87 {dimension_numbers = #tpu.dot_dimension_numbers<[1], [0], [0], [1], [0, 0, 1, 1], [], []>} : vector<8x256xf32>, vector<256x128xf32>, vector<8x128xf32> -> vector<8x128xf32>
      %c0_88 = arith.constant 0 : index
      %c0_89 = arith.constant 0 : index
      %149 = vector.load %arg14[%c0_88, %c0_89] : memref<1x128xf32, #tpu.memory_space<vmem>>, vector<1x128xf32>
      %150 = vector.broadcast %149 : vector<1x128xf32> to vector<8x128xf32>
      %151 = arith.addf %148, %150 : vector<8x128xf32>
      %cst_90 = arith.constant 0.000000e+00 : f32
      %152 = vector.broadcast %cst_90 : f32 to vector<8x128xf32>
      %153 = arith.cmpf oge, %151, %152 : vector<8x128xf32>
      %cst_91 = arith.constant 0.00999999977 : f32
      %154 = vector.broadcast %cst_91 : f32 to vector<8x128xf32>
      %155 = arith.mulf %154, %151 : vector<8x128xf32>
      %156 = arith.select %153, %151, %155 : vector<8x128xi1>, vector<8x128xf32>
      %c0_92 = arith.constant 0 : index
      %c0_93 = arith.constant 0 : index
      %157 = vector.load %arg15[%c0_92, %c0_93] : memref<128x128xf32, #tpu.memory_space<vmem>>, vector<128x128xf32>
      %cst_94 = arith.constant dense<0.000000e+00> : vector<8x128xf32>
      %158 = tpu.matmul %156, %157, %cst_94 {dimension_numbers = #tpu.dot_dimension_numbers<[1], [0], [0], [1], [0, 0, 1, 1], [], []>} : vector<8x128xf32>, vector<128x128xf32>, vector<8x128xf32> -> vector<8x128xf32>
      %c0_95 = arith.constant 0 : index
      %c0_96 = arith.constant 0 : index
      %159 = vector.load %arg16[%c0_95, %c0_96] : memref<1x128xf32, #tpu.memory_space<vmem>>, vector<1x128xf32>
      %160 = vector.broadcast %159 : vector<1x128xf32> to vector<8x128xf32>
      %161 = arith.addf %158, %160 : vector<8x128xf32>
      %cst_97 = arith.constant 0.000000e+00 : f32
      %162 = vector.broadcast %cst_97 : f32 to vector<8x128xf32>
      %163 = arith.cmpf oge, %161, %162 : vector<8x128xf32>
      %cst_98 = arith.constant 0.00999999977 : f32
      %164 = vector.broadcast %cst_98 : f32 to vector<8x128xf32>
      %165 = arith.mulf %164, %161 : vector<8x128xf32>
      %166 = arith.select %163, %161, %165 : vector<8x128xi1>, vector<8x128xf32>
      %c0_99 = arith.constant 0 : index
      %c0_100 = arith.constant 0 : index
      %167 = vector.load %arg17[%c0_99, %c0_100] : memref<128x128xf32, #tpu.memory_space<vmem>>, vector<128x128xf32>
      %cst_101 = arith.constant dense<0.000000e+00> : vector<8x128xf32>
      %168 = tpu.matmul %166, %167, %cst_101 {dimension_numbers = #tpu.dot_dimension_numbers<[1], [0], [0], [1], [0, 0, 1, 1], [], []>} : vector<8x128xf32>, vector<128x128xf32>, vector<8x128xf32> -> vector<8x128xf32>
      %c0_102 = arith.constant 0 : index
      %c0_103 = arith.constant 0 : index
      %169 = vector.load %arg18[%c0_102, %c0_103] : memref<1x128xf32, #tpu.memory_space<vmem>>, vector<1x128xf32>
      %170 = vector.broadcast %169 : vector<1x128xf32> to vector<8x128xf32>
      %171 = arith.addf %168, %170 : vector<8x128xf32>
      %c0_104 = arith.constant 0 : index
      %c0_105 = arith.constant 0 : index
      %172 = vector.load %arg19[%c0_104, %c0_105] : memref<8x128xf32, #tpu.memory_space<vmem>>, vector<8x128xf32>
      tpu.vector_store %arg19[%c0_104, %c0_105], %171 {strides = array<i32>} : memref<8x128xf32, #tpu.memory_space<vmem>>, vector<8x128xf32>,
    } else {
    }
    return
  }
  func.func @transform_0(%arg0: i32) -> (i32, i32, i32) {
    %c0_i32 = arith.constant 0 : i32
    %c0_i32_0 = arith.constant 0 : i32
    %c0_i32_1 = arith.constant 0 : i32
    return %arg0, %c0_i32, %c0_i32_0 : i32, i32, i32
  }
  func.func @transform_1(%arg0: i32) -> (i32, i32) {
    %c0_i32 = arith.constant 0 : i32
    %c0_i32_0 = arith.constant 0 : i32
    %c0_i32_1 = arith.constant 0 : i32
    return %c0_i32, %c0_i32_0 : i32, i32
  }
  func.func @transform_2(%arg0: i32) -> (i32, i32) {
    %c0_i32 = arith.constant 0 : i32
    %c0_i32_0 = arith.constant 0 : i32
    %c0_i32_1 = arith.constant 0 : i32
    return %c0_i32, %c0_i32_0 : i32, i32
  }
  func.func @transform_3(%arg0: i32) -> (i32, i32) {
    %c0_i32 = arith.constant 0 : i32
    %c0_i32_0 = arith.constant 0 : i32
    %c0_i32_1 = arith.constant 0 : i32
    return %c0_i32, %c0_i32_0 : i32, i32
  }
  func.func @transform_4(%arg0: i32) -> (i32, i32) {
    %c0_i32 = arith.constant 0 : i32
    %c0_i32_0 = arith.constant 0 : i32
    %c0_i32_1 = arith.constant 0 : i32
    return %c0_i32, %c0_i32_0 : i32, i32
  }
  func.func @transform_5(%arg0: i32) -> (i32, i32) {
    %c0_i32 = arith.constant 0 : i32
    %c0_i32_0 = arith.constant 0 : i32
    %c0_i32_1 = arith.constant 0 : i32
    return %c0_i32, %c0_i32_0 : i32, i32
  }
  func.func @transform_6(%arg0: i32) -> (i32, i32) {
    %c0_i32 = arith.constant 0 : i32
    %c0_i32_0 = arith.constant 0 : i32
    %c0_i32_1 = arith.constant 0 : i32
    return %c0_i32, %c0_i32_0 : i32, i32
  }
  func.func @transform_7(%arg0: i32) -> (i32, i32) {
    %c0_i32 = arith.constant 0 : i32
    %c0_i32_0 = arith.constant 0 : i32
    %c0_i32_1 = arith.constant 0 : i32
    return %c0_i32, %c0_i32_0 : i32, i32
  }
  func.func @transform_8(%arg0: i32) -> (i32, i32) {
    %c0_i32 = arith.constant 0 : i32
    %c0_i32_0 = arith.constant 0 : i32
    %c0_i32_1 = arith.constant 0 : i32
    return %c0_i32, %c0_i32_0 : i32, i32
  }
  func.func @transform_9(%arg0: i32) -> (i32, i32) {
    %c0_i32 = arith.constant 0 : i32
    %c0_i32_0 = arith.constant 0 : i32
    %c0_i32_1 = arith.constant 0 : i32
    return %c0_i32, %c0_i32_0 : i32, i32
  }
  func.func @transform_10(%arg0: i32) -> (i32, i32) {
    %c0_i32 = arith.constant 0 : i32
    %c0_i32_0 = arith.constant 0 : i32
    %c0_i32_1 = arith.constant 0 : i32
    return %c0_i32, %c0_i32_0 : i32, i32
  }
  func.func @transform_11(%arg0: i32) -> (i32, i32) {
    %c0_i32 = arith.constant 0 : i32
    %c0_i32_0 = arith.constant 0 : i32
    %c0_i32_1 = arith.constant 0 : i32
    return %c0_i32, %c0_i32_0 : i32, i32
  }
  func.func @transform_12(%arg0: i32) -> (i32, i32) {
    %c0_i32 = arith.constant 0 : i32
    %c0_i32_0 = arith.constant 0 : i32
    %c0_i32_1 = arith.constant 0 : i32
    return %c0_i32, %c0_i32_0 : i32, i32
  }
  func.func @transform_13(%arg0: i32) -> (i32, i32) {
    %c0_i32 = arith.constant 0 : i32
    %c0_i32_0 = arith.constant 0 : i32
    %c0_i32_1 = arith.constant 0 : i32
    return %c0_i32, %c0_i32_0 : i32, i32
  }
  func.func @transform_14(%arg0: i32) -> (i32, i32) {
    %c0_i32 = arith.constant 0 : i32
    %c0_i32_0 = arith.constant 0 : i32
    %c0_i32_1 = arith.constant 0 : i32
    return %c0_i32, %c0_i32_0 : i32, i32
  }
  func.func @transform_15(%arg0: i32) -> (i32, i32) {
    %c0_i32 = arith.constant 0 : i32
    %c0_i32_0 = arith.constant 0 : i32
    %c0_i32_1 = arith.constant 0 : i32
    return %c0_i32, %c0_i32_0 : i32, i32
  }
  func.func @transform_16(%arg0: i32) -> (i32, i32) {
    %c0_i32 = arith.constant 0 : i32
    %c0_i32_0 = arith.constant 0 : i32
    %c0_i32_1 = arith.constant 0 : i32
    return %c0_i32, %c0_i32_0 : i32, i32
  }
  func.func @transform_17(%arg0: i32) -> (i32, i32) {
    %c0_i32 = arith.constant 0 : i32
    %c0_i32_0 = arith.constant 0 : i32
    %c0_i32_1 = arith.constant 0 : i32
    return %c0_i32, %c0_i32_0 : i32, i32
  }
  func.func @transform_18(%arg0: i32) -> (i32, i32) {
    %c0_i32 = arith.constant 0 : i32
    %c0_i32_0 = arith.constant 0 : i32
    %c0_i32_1 = arith.constant 0 : i32
    return %c0_i32, %c0_i32_0 : i32, i32
  }
}

</mosaic_0001>

<bundles_post_ra>
// kernel: lstm_classifier_forward.1
= control target key start
LH: loop header
LB: loop body
LE: loop exit
PB: predicated region body
PF: predicated region fallthrough
CT: control target
= control target key end

     0   :  { %s4341_s0 = inlined_call_operand.vmem [shape: f32[8,8,128], index: 0, kind: input, shape index: {}]   ;;  %s4342_s1 = inlined_call_operand.hbm [shape: f32[128,512], index: 1, kind: input, shape index: {}]   ;;  %s4343_s2 = inlined_call_operand.hbm [shape: f32[128,512], index: 2, kind: input, shape index: {}]   ;;  %s4344_s3 = inlined_call_operand.vmem [shape: f32[1,512], index: 3, kind: input, shape index: {}]   ;;  %s4345_s4 = inlined_call_operand.hbm [shape: f32[128,512], index: 4, kind: input, shape index: {}]   ;;  %s4346_s5 = inlined_call_operand.hbm [shape: f32[128,512], index: 5, kind: input, shape index: {}]   ;;  %s4347_s6 = inlined_call_operand.vmem [shape: f32[1,512], index: 6, kind: input, shape index: {}]   ;;  %s4348_s7 = inlined_call_operand.hbm [shape: f32[128,512], index: 7, kind: input, shape index: {}]   ;;  %s4349_s8 = inlined_call_operand.hbm [shape: f32[128,512], index: 8, kind: input, shape index: {}]   ;;  %s4350_s9 = inlined_call_operand.vmem [shape: f32[1,512], index: 9, kind: input, shape index: {}]   ;;  %s4351_s10 = inlined_call_operand.vmem [shape: f32[128,256], index: 10, kind: input, shape index: {}]   ;;  %s4352_s11 = inlined_call_operand.vmem [shape: f32[1,256], index: 11, kind: input, shape index: {}]   ;;  %s4353_s12 = inlined_call_operand.hbm [shape: f32[256,128], index: 12, kind: input, shape index: {}]   ;;  %s4354_s13 = inlined_call_operand.vmem [shape: f32[1,128], index: 13, kind: input, shape index: {}]   ;;  %s4355_s14 = inlined_call_operand.hbm [shape: f32[128,128], index: 14, kind: input, shape index: {}]   ;;  %s4356_s15 = inlined_call_operand.vmem [shape: f32[1,128], index: 15, kind: input, shape index: {}]   ;;  %s4357_s16 = inlined_call_operand.hbm [shape: f32[128,128], index: 16, kind: input, shape index: {}]   ;;  %s4358_s17 = inlined_call_operand.vmem [shape: f32[1,128], index: 17, kind: input, shape index: {}]   ;;  %s4359_s18 = inlined_call_operand.vmem [shape: f32[8,128], index: 18, kind: output, shape index: {}]  }
   0x1   :  { %4373 = sst [smem:[#allocation28_spill]] %s4341_s0 }
   0x2   :  { %4374 = sst [smem:[#allocation29_spill]] %s4342_s1 }
   0x3   :  { %4375 = sst [smem:[#allocation30_spill]] %s4343_s2 }
   0x4   :  { %4376 = sst [smem:[#allocation31_spill]] %s4346_s5 }
   0x5   :  { %4377 = sst [smem:[#allocation32_spill]] %s4354_s13 }
   0x6   :  { %4378 = sst [smem:[#allocation33_spill]] %s4356_s15 }
   0x7   :  { %4379 = sst [smem:[#allocation34_spill]] %s4358_s17 }
   0x8   :  { %4380 = sst [smem:[#allocation35_spill]] %s4359_s18 }
   0x9   :  { %23 = vsyncpa [#allocation9], 0 }
   0xa   :  { %24 = vsyncpa [#allocation11], 0 }
   0xb   :  { %25 = vsyncpa [#allocation14], 0 }
   0xc   :  { %26 = vsyncpa [#allocation17], 0 }
   0xd   :  { %27 = vsyncpa [#allocation20], 0  ;;  %s3867_s27 = smov 0  }
   0xe LB: > { %4381 = sst [smem:[#allocation27_spill]] %s3752_s27  ;;  %s3873_s28 = sadd.s32 4294967295, %s3752_s27   ;;  %s3752_s27 = sphi %s3867_s27, %s33_s27  }
   0xf   : > { %p2642_p0 = scmp.ge.s32.totalorder %s3752_s27, 1  ;;  %p442_p1 = scmp.lt.s32.totalorder %s3752_s27, 9 }
  0x10   : > { %p4363_p3 = scmp.eq.s32.totalorder %s3873_s28, 0  ;;  %s3754_s30 = smov [#allocation10]  }
  0x11   : > { %p3879_p4 = pnand %p2642_p0, %p442_p1  ;;  %s467_s0 = sshll.u32 %s3754_s30, 4  ;;  %s3883_s0 = int_to_ptr.vmem [resolvable:$true] %s467_s0 }
  0x12   : > { %s3755_s19 = smov [#allocation13]   ;;  %s3756_s21 = smov [#allocation16]  }
  0x13   : > { %s4382_s29 = scalar_select %p3879_p4, 1, 0 }
  0x14   : > { %p3354_p5 = pneg %p3879_p4  ;;  %s496_s1 = sshll.u32 %s3755_s19, 4  ;;  %s3887_s1 = int_to_ptr.vmem [resolvable:$true] %s496_s1 }
  0x15   : > { %s525_s22 = sshll.u32 %s3756_s21, 4  ;;  %s4384_s24 = sld [smem:[#allocation30_spill]]  ;;  %s3895_s22 = int_to_ptr.vmem [resolvable:$true] %s525_s22 }
  0x16   : > { %p3891_p6 = pnand %p4363_p3, %p3354_p5 }
  0x18   : > { %p3905_p8 = pneg %p3891_p6 }
  0x1b   : > { %s3474_s25 = scalar_lea.hbm %s4384_s24, 8192 }
  0x1c   : > { %p3475_p7 = scmp.ne.s32.totalorder %s4384_s24, %s3474_s25  ;;  %p3481_p11 = scmp.lt.u32.totalorder %s3474_s25, %s4384_s24 }
  0x1e   : > { %p3477_p9 = pnand %p3905_p8, %p3475_p7 }
  0x20   : > { %p3478_p10 = pneg %p3477_p9 }
  0x22   : > { %p3483_p12 = pnand %p3481_p11, %p3478_p10 }
  0x24   : > { %3486 = shalt.err (!%p3483_p12)
}
  0x25   : > { %s3487_s2 = scalar_lea.vmem %s3883_s0, 8192  ;;  %p3495_p5 = scmp.lt.s32.totalorder %s3883_s0, %s3883_s0 }
  0x26   : > { %p3488_p13 = scmp.ne.s32.totalorder %s3883_s0, %s3487_s2  ;;  %p3496_p2 = scmp.lt.s32.totalorder %s3487_s2, %s3487_s2 }
  0x28   : > { %p3490_p0 = pnand %p3488_p13, %p3905_p8  ;;  %p3497_p7 = por %p3496_p2, %p3495_p5 }
  0x2a   : > { %p3491_p1 = pneg %p3490_p0 }
  0x2c   : > { %p3498_p9 = pnand %p3497_p7, %p3491_p1 }
  0x2e   : > { %3501 = shalt.err (!%p3498_p9)
}
  0x2f   : > { %s4365_s23 = smov 512   ;;  %s4367_s27 = smov 32  }
  0x30   : > { %3360 = dma.hbm_to_vmem [thread:$0]  (!%p3891_p6), %s4384_s24, 8192, %s3883_s0, [#allocation11], %s4365_s23, %s4365_s23, %s4367_s27  }
  0x31   : > { %s4386_s5 = sld [smem:[#allocation31_spill]] }
  0x37   : > { %s3502_s2 = scalar_lea.hbm %s4386_s5, 8192 }
  0x38   : > { %p3503_p2 = scmp.ne.s32.totalorder %s4386_s5, %s3502_s2  ;;  %p3509_p12 = scmp.lt.u32.totalorder %s3502_s2, %s4386_s5 }
  0x3a   : > { %p3505_p10 = pnand %p3503_p2, %p3905_p8 }
  0x3c   : > { %p3506_p11 = pneg %p3505_p10 }
  0x3e   : > { %p3511_p13 = pnand %p3509_p12, %p3506_p11 }
  0x40   : > { %3514 = shalt.err (!%p3511_p13)
}
  0x41   : > { %s3515_s0 = scalar_lea.vmem %s3887_s1, 8192  ;;  %p3523_p7 = scmp.lt.s32.totalorder %s3887_s1, %s3887_s1 }
  0x42   : > { %p3516_p0 = scmp.ne.s32.totalorder %s3887_s1, %s3515_s0  ;;  %p3524_p9 = scmp.lt.s32.totalorder %s3515_s0, %s3515_s0 }
  0x44   : > { %p3518_p1 = pnand %p3516_p0, %p3905_p8  ;;  %p3525_p2 = por %p3524_p9, %p3523_p7 }
  0x46   : > { %p3519_p5 = pneg %p3518_p1 }
  0x48   : > { %p3526_p10 = pnand %p3525_p2, %p3519_p5 }
  0x4a   : > { %3529 = shalt.err (!%p3526_p10)
}
  0x4b   : > { %3366 = dma.hbm_to_vmem [thread:$0]  (!%p3891_p6), %s4386_s5, 8192, %s3887_s1, [#allocation14], %s4365_s23, %s4365_s23, %s4367_s27  }
  0x4c   : > { %s3530_s25 = scalar_lea.hbm %s4349_s8, 8192 }
  0x4d   : > { %p3531_p11 = scmp.ne.s32.totalorder %s4349_s8, %s3530_s25  ;;  %p3537_p0 = scmp.lt.u32.totalorder %s3530_s25, %s4349_s8 }
  0x4f   : > { %p3533_p12 = pnand %p3531_p11, %p3905_p8 }
  0x51   : > { %p3534_p13 = pneg %p3533_p12 }
  0x53   : > { %p3539_p1 = pnand %p3537_p0, %p3534_p13 }
  0x55   : > { %3542 = shalt.err (!%p3539_p1)
}
  0x56   : > { %s3543_s1 = scalar_lea.vmem %s3895_s22, 8192  ;;  %p3551_p2 = scmp.lt.s32.totalorder %s3895_s22, %s3895_s22 }
  0x57   : > { %p3544_p5 = scmp.ne.s32.totalorder %s3895_s22, %s3543_s1  ;;  %p3552_p10 = scmp.lt.s32.totalorder %s3543_s1, %s3543_s1 }
  0x59   : > { %p3546_p7 = pnand %p3544_p5, %p3905_p8  ;;  %p3553_p11 = por %p3552_p10, %p3551_p2 }
  0x5b   : > { %p3547_p9 = pneg %p3546_p7 }
  0x5d   : > { %p3554_p12 = pnand %p3553_p11, %p3547_p9 }
  0x5f   : > { %3557 = shalt.err (!%p3554_p12)
}
  0x60   : > { %3372 = dma.hbm_to_vmem [thread:$0]  (!%p3891_p6), %s4349_s8, 8192, %s3895_s22, [#allocation17], %s4365_s23, %s4365_s23, %s4367_s27  }
  0x61   : > { %s3759_s15 = smov [#allocation19]   ;;  %s3760_s18 = smov [#allocation8]  }
  0x62   : > { %s563_s17 = sshll.u32 %s3759_s15, 4  ;;  %s454_s25 = sshll.u32 %s3760_s18, 4  ;;  %s564_s17 = int_to_ptr.vmem [resolvable:$true] %s563_s17  ;;  %s3981_s25 = int_to_ptr.vmem [resolvable:$true] %s454_s25 }
  0x63   : > { %s3558_s21 = scalar_lea.hbm %s4355_s14, 2048 }
  0x64   : > { %p3559_p13 = scmp.ne.s32.totalorder %s4355_s14, %s3558_s21  ;;  %p3565_p5 = scmp.lt.u32.totalorder %s3558_s21, %s4355_s14 }
  0x66   : > { %p3561_p0 = pnand %p3559_p13, %p3905_p8 }
  0x68   : > { %p3562_p1 = pneg %p3561_p0 }
  0x6a   : > { %p3567_p7 = pnand %p3565_p5, %p3562_p1 }
  0x6c   : > { %3570 = shalt.err (!%p3567_p7)
}
  0x6d   : > { %s3571_s13 = scalar_lea.vmem %s564_s17, 2048  ;;  %p3579_p11 = scmp.lt.s32.totalorder %s564_s17, %s564_s17 }
  0x6e   : > { %p3572_p9 = scmp.ne.s32.totalorder %s564_s17, %s3571_s13  ;;  %p3580_p12 = scmp.lt.s32.totalorder %s3571_s13, %s3571_s13 }
  0x70   : > { %p3574_p2 = pnand %p3572_p9, %p3905_p8  ;;  %p3581_p3 = por %p3580_p12, %p3579_p11 }
  0x72   : > { %p3575_p10 = pneg %p3574_p2 }
  0x74   : > { %p3582_p4 = pnand %p3581_p3, %p3575_p10 }
  0x76   : > { %3585 = shalt.err (!%p3582_p4)
}
  0x77   : > { %s4369_s15 = smov 128   ;;  %s4371_s18 = smov 8  }
  0x78   : > { %3378 = dma.hbm_to_vmem [thread:$0]  (!%p3891_p6), %s4355_s14, 2048, %s564_s17, [#allocation20], %s4369_s15, %s4369_s15, %s4371_s18  }
  0x79   : > { %s4387_s1 = sld [smem:[#allocation29_spill]] }
  0x7f   : > { %s3586_s0 = scalar_lea.hbm %s4387_s1, 8192 }
  0x80   : > { %p3587_p3 = scmp.ne.s32.totalorder %s4387_s1, %s3586_s0  ;;  %p3593_p0 = scmp.lt.u32.totalorder %s3586_s0, %s4387_s1 }
  0x82   : > { %p3589_p4 = pnand %p3587_p3, %p3905_p8 }
  0x84   : > { %p3590_p13 = pneg %p3589_p4 }
  0x86   : > { %p3595_p1 = pnand %p3593_p0, %p3590_p13 }
  0x88   : > { %3598 = shalt.err (!%p3595_p1)
}
  0x89   : > { %s3599_s17 = scalar_lea.vmem %s3981_s25, 8192  ;;  %p3607_p2 = scmp.lt.s32.totalorder %s3981_s25, %s3981_s25 }
  0x8a   : > { %p3600_p5 = scmp.ne.s32.totalorder %s3981_s25, %s3599_s17  ;;  %p3608_p10 = scmp.lt.s32.totalorder %s3599_s17, %s3599_s17 }
  0x8c   : > { %p3602_p7 = pnand %p3600_p5, %p3905_p8  ;;  %p3609_p11 = por %p3608_p10, %p3607_p2 }
  0x8e   : > { %p3603_p9 = pneg %p3602_p7 }
  0x90   : > { %p3610_p12 = pnand %p3609_p11, %p3603_p9 }
  0x92   : > { %3613 = shalt.err (!%p3610_p12)
}
  0x93   : > { %s4388_s23 = smov 32   ;;  %s4389_s27 = smov 512  }
  0x94   : > { %3357 = dma.hbm_to_vmem [thread:$0]  (!%p3891_p6), %s4387_s1, 8192, %s3981_s25, [#allocation9], %s4389_s27, %s4389_s27, %s4388_s23  }
  0x95   : > { %s3763_s21 = smov [#allocation12]   ;;  %s3764_s0 = smov [#allocation15]  }
  0x96   : > { %s483_s2 = sshll.u32 %s3763_s21, 4  ;;  %s512_s22 = sshll.u32 %s3764_s0, 4  ;;  %s484_s2 = int_to_ptr.vmem [resolvable:$true] %s483_s2  ;;  %s4030_s22 = int_to_ptr.vmem [resolvable:$true] %s512_s22 }
  0x97   : > { %s3614_s15 = scalar_lea.hbm %s4345_s4, 8192 }
  0x98   : > { %p3615_p3 = scmp.ne.s32.totalorder %s4345_s4, %s3614_s15  ;;  %p3621_p0 = scmp.lt.u32.totalorder %s3614_s15, %s4345_s4 }
  0x9a   : > { %p3617_p4 = pnand %p3615_p3, %p3905_p8 }
  0x9c   : > { %p3618_p13 = pneg %p3617_p4 }
  0x9e   : > { %p3623_p1 = pnand %p3621_p0, %p3618_p13 }
  0xa0   : > { %3626 = shalt.err (!%p3623_p1)
}
  0xa1   : > { %s3627_s30 = scalar_lea.vmem %s484_s2, 8192  ;;  %p3635_p2 = scmp.lt.s32.totalorder %s484_s2, %s484_s2 }
  0xa2   : > { %p3628_p5 = scmp.ne.s32.totalorder %s484_s2, %s3627_s30  ;;  %p3636_p10 = scmp.lt.s32.totalorder %s3627_s30, %s3627_s30 }
  0xa4   : > { %p3630_p7 = pnand %p3628_p5, %p3905_p8  ;;  %p3637_p11 = por %p3636_p10, %p3635_p2 }
  0xa6   : > { %p3631_p9 = pneg %p3630_p7 }
  0xa8   : > { %p3638_p12 = pnand %p3637_p11, %p3631_p9 }
  0xaa   : > { %3641 = shalt.err (!%p3638_p12)
}
  0xab   : > { %3363 = dma.hbm_to_vmem [thread:$0]  (!%p3891_p6), %s4345_s4, 8192, %s484_s2, [#allocation11], %s4389_s27, %s4389_s27, %s4388_s23  }
  0xac   : > { %s3642_s0 = scalar_lea.hbm %s4348_s7, 8192 }
  0xad   : > { %p3643_p3 = scmp.ne.s32.totalorder %s4348_s7, %s3642_s0  ;;  %p3649_p0 = scmp.lt.u32.totalorder %s3642_s0, %s4348_s7 }
  0xaf   : > { %p3645_p4 = pnand %p3643_p3, %p3905_p8 }
  0xb1   : > { %p3646_p13 = pneg %p3645_p4 }
  0xb3   : > { %p3651_p1 = pnand %p3649_p0, %p3646_p13 }
  0xb5   : > { %3654 = shalt.err (!%p3651_p1)
}
  0xb6   : > { %s3655_s2 = scalar_lea.vmem %s4030_s22, 8192  ;;  %p3663_p2 = scmp.lt.s32.totalorder %s4030_s22, %s4030_s22 }
  0xb7   : > { %p3656_p5 = scmp.ne.s32.totalorder %s4030_s22, %s3655_s2  ;;  %p3664_p10 = scmp.lt.s32.totalorder %s3655_s2, %s3655_s2 }
  0xb9   : > { %p3658_p7 = pnand %p3656_p5, %p3905_p8  ;;  %p3665_p11 = por %p3664_p10, %p3663_p2 }
  0xbb   : > { %p3659_p9 = pneg %p3658_p7 }
  0xbd   : > { %p3666_p12 = pnand %p3665_p11, %p3659_p9 }
  0xbf   : > { %3669 = shalt.err (!%p3666_p12)
}
  0xc0   : > { %3369 = dma.hbm_to_vmem [thread:$0]  (!%p3891_p6), %s4348_s7, 8192, %s4030_s22, [#allocation14], %s4389_s27, %s4389_s27, %s4388_s23  }
  0xc1   : > { %s3765_s15 = smov [#allocation18]   ;;  %s3766_s21 = smov [#allocation21]  }
  0xc2   : > { %s547_s18 = sshll.u32 %s3765_s15, 4  ;;  %s579_s0 = sshll.u32 %s3766_s21, 4  ;;  %s548_s18 = int_to_ptr.vmem [resolvable:$true] %s547_s18  ;;  %s4079_s0 = int_to_ptr.vmem [resolvable:$true] %s579_s0 }
  0xc3   : > { %s3670_s26 = scalar_lea.hbm %s4353_s12, 4096 }
  0xc4   : > { %p3671_p3 = scmp.ne.s32.totalorder %s4353_s12, %s3670_s26  ;;  %p3677_p0 = scmp.lt.u32.totalorder %s3670_s26, %s4353_s12 }
  0xc6   : > { %p3673_p4 = pnand %p3671_p3, %p3905_p8 }
  0xc8   : > { %p3674_p13 = pneg %p3673_p4 }
  0xca   : > { %p3679_p1 = pnand %p3677_p0, %p3674_p13 }
  0xcc   : > { %3682 = shalt.err (!%p3679_p1)
}
  0xcd   : > { %s3683_s27 = scalar_lea.vmem %s548_s18, 4096  ;;  %p3691_p2 = scmp.lt.s32.totalorder %s548_s18, %s548_s18 }
  0xce   : > { %p3684_p5 = scmp.ne.s32.totalorder %s548_s18, %s3683_s27  ;;  %p3692_p10 = scmp.lt.s32.totalorder %s3683_s27, %s3683_s27 }
  0xd0   : > { %p3686_p7 = pnand %p3684_p5, %p3905_p8  ;;  %p3693_p11 = por %p3692_p10, %p3691_p2 }
  0xd2   : > { %p3687_p9 = pneg %p3686_p7 }
  0xd4   : > { %p3694_p12 = pnand %p3693_p11, %p3687_p9 }
  0xd6   : > { %3697 = shalt.err (!%p3694_p12)
}
  0xd7   : > { %s4390_s22 = smov 8   ;;  %s4391_s5 = smov 128  }
  0xd8   : > { %3375 = dma.hbm_to_vmem [thread:$0]  (!%p3891_p6), %s4353_s12, 4096, %s548_s18, [#allocation17], %s4391_s5, %s4391_s5, %s4390_s22  }
  0xd9   : > { %s3698_s26 = scalar_lea.hbm %s4357_s16, 2048 }
  0xda   : > { %p3699_p3 = scmp.ne.s32.totalorder %s4357_s16, %s3698_s26  ;;  %p3705_p0 = scmp.lt.u32.totalorder %s3698_s26, %s4357_s16 }
  0xdc   : > { %p3701_p4 = pnand %p3699_p3, %p3905_p8 }
  0xde   : > { %p3702_p13 = pneg %p3701_p4 }
  0xe0   : > { %p3707_p1 = pnand %p3705_p0, %p3702_p13 }
  0xe2   : > { %3710 = shalt.err (!%p3707_p1)
}
  0xe3   : > { %s3711_s18 = scalar_lea.vmem %s4079_s0, 2048  ;;  %p3719_p2 = scmp.lt.s32.totalorder %s4079_s0, %s4079_s0 }
  0xe4   : > { %p3712_p5 = scmp.ne.s32.totalorder %s4079_s0, %s3711_s18  ;;  %p3720_p10 = scmp.lt.s32.totalorder %s3711_s18, %s3711_s18 }
  0xe6   : > { %p3714_p7 = pnand %p3712_p5, %p3905_p8  ;;  %p3721_p11 = por %p3720_p10, %p3719_p2 }
  0xe8   : > { %p3715_p9 = pneg %p3714_p7 }
  0xea   : > { %p3722_p12 = pnand %p3721_p11, %p3715_p9 }
  0xec   : > { %3725 = shalt.err (!%p3722_p12)
}
  0xed   : > { %3381 = dma.hbm_to_vmem [thread:$0]  (!%p3891_p6), %s4357_s16, 2048, %s4079_s0, [#allocation20], %s4391_s5, %s4391_s5, %s4390_s22  }
  0xee   : > { %p4392_p3 = scmp.ne.s32.totalorder %s4382_s29, 0 }
  0xef   : > { %p4393_p8 = scmp.eq.s32.totalorder (!%p4392_p3), %s3873_s28, 0 }
  0xf0   : > { %605 = sbr.rel (%p4392_p3) target bundleno = 1998 (0x7ce), region = 92 }
  0xf7   : > { %3731 = dma.done.wait (%p4393_p8), [#allocation9], 8192   ;;  %p4394_p4 = pmov %p4393_p8 }
  0xf9   : > { %3733 = vsyncadd (%p4394_p4), [#allocation9], 4294959104  ;;  %p4395_p13 = pmov %p4394_p4 }
  0xfa   : > { %p4396_p0 = pmov %p4394_p4 }
  0xfb   : > { %3735 = dma.done.wait (%p4395_p13), [#allocation11], 16384  }
  0xfc   : > { %3737 = vsyncadd (%p4396_p0), [#allocation11], 4294950912  ;;  %p4397_p1 = pmov %p4396_p0 }
  0xfd   : > { %p4398_p6 = pmov %p4396_p0 }
  0xfe   : > { %3739 = dma.done.wait (%p4397_p1), [#allocation14], 16384  }
  0xff   : > { %3741 = vsyncadd (%p4398_p6), [#allocation14], 4294950912  ;;  %p4399_p5 = pmov %p4396_p0 }
 0x100   : > { %p4400_p7 = pmov %p4396_p0 }
 0x101   : > { %3743 = dma.done.wait (%p4399_p5), [#allocation17], 12288  }
 0x102   : > { %3745 = vsyncadd (%p4400_p7), [#allocation17], 4294955008  ;;  %p4401_p9 = pmov %p4396_p0 }
 0x103   : > { %p4402_p2 = pmov %p4396_p0 }
 0x104   : > { %3747 = dma.done.wait (%p4401_p9), [#allocation20], 4096  }
 0x105   : > { %3749 = vsyncadd (%p4402_p2), [#allocation20], 4294963200  ;;  %p685_p10 = scmp.lt.s32.totalorder %s3873_s28, 7  ;;  %s4403_s22 = sld [smem:[#allocation28_spill]] }
 0x106   : > { %p4404_p11 = scmp.ne.s32.totalorder %s3873_s28, 0 }
 0x107   : > { %s686_s29 = scalar_select %p685_p10, %s3873_s28, 7 }
 0x108   : > { %692 = sbr.rel (%p4404_p11) target bundleno = 271 (0x10f), region = 132  ;;  %v3767_v0 = vmov (!%p4404_p11), 0.0  }
 0x109   : > { %s2663_s20 = sshll.u32 %s686_s29, 3  ;;  %693 = vst [vmem:[#allocation2] sm:$0xff] (!%p4404_p11), %v3767_v0  ;;  %694 = vst [vmem:[#allocation3] sm:$0xff] (!%p4404_p11), %v3767_v0 }
 0x10a   : > { %695 = vst [vmem:[#allocation4] sm:$0xff] (!%p4404_p11), %v3767_v0  ;;  %696 = vst [vmem:[#allocation5] sm:$0xff] (!%p4404_p11), %v3767_v0 }
 0x10b   : > { %s4155_s5 = scalar_lea.vmem %s4403_s22, %s2663_s20  ;;  %697 = vst [vmem:[#allocation6] sm:$0xff] (!%p4404_p11), %v3767_v0  ;;  %698 = vst [vmem:[#allocation7] sm:$0xff] (!%p4404_p11), %v3767_v0 }
 0x10f PF: > { %v766_v1 = vld [vmem:[#allocation10 + $0x8] sm:$0xff]  ;;  %v768_v3 = vld [vmem:[#allocation10 + $0x18] sm:$0xff]  ;;  %v765_v6 = vld [vmem:[#allocation10] sm:$0xff]  ;;  %v3768_v8 = vmov 0.0   ;;  %p2665_p12 = scmp.ne.s32.totalorder %s3873_s28, 7 }
 0x110   : > { %v770_v2 = vld [vmem:[#allocation10 + $0x28] sm:$0xff]  ;;  %v772_v5 = vld [vmem:[#allocation10 + $0x38] sm:$0xff]  ;;  %v769_v7 = vld [vmem:[#allocation10 + $0x20] sm:$0xff]  ;;  %893 = vmatprep.mubr.f32.mxu0 %v3768_v8  ;;  %964 = vmatprep.mubr.f32.mxu1 %v3768_v8  ;;  %vm3771_vm2 = vmmov (!%p2665_p12), 0   ;;  %s4405_s17 = sld [smem:[#allocation32_spill]] (!%p2665_p12)  ;;  %s4406_s2 = sld [smem:[#allocation33_spill]] (!%p2665_p12) }
 0x111   : > { %v2810_v4 = vpack.c.bf16 %v770_v2, %v766_v1  ;;  %v2842_v9 = vpack.c.bf16 %v772_v5, %v768_v3  ;;  %v2812_v10 = vpack.c.bf16 %v769_v7, %v765_v6  ;;  %v767_v11 = vld [vmem:[#allocation10 + $0x10] sm:$0xff]  ;;  %v774_v13 = vld [vmem:[#allocation10 + $0x48] sm:$0xff]  ;;  %v776_v16 = vld [vmem:[#allocation10 + $0x58] sm:$0xff]  ;;  %s4407_s18 = sld [smem:[#allocation34_spill]] (!%p2665_p12)  ;;  %s4408_s29 = sld [smem:[#allocation35_spill]] (!%p2665_p12) }
 0x112   : > { %v771_v12 = vld [vmem:[#allocation10 + $0x30] sm:$0xff]  ;;  %v778_v15 = vld [vmem:[#allocation10 + $0x68] sm:$0xff]  ;;  %v780_v17 = vld [vmem:[#allocation10 + $0x78] sm:$0xff] }
 0x113   : > { %2811 = vmatprep.subr.bf16.mxu0 %v2810_v4  ;;  %v2844_v14 = vpack.c.bf16 %v771_v12, %v767_v11  ;;  %2843 = vmatprep.subr.bf16.mxu1 %v2842_v9  ;;  %v2814_v18 = vpack.c.bf16 %v778_v15, %v774_v13  ;;  %v2846_v19 = vpack.c.bf16 %v780_v17, %v776_v16  ;;  %v773_v20 = vld [vmem:[#allocation10 + $0x40] sm:$0xff]  ;;  %v775_v22 = vld [vmem:[#allocation10 + $0x50] sm:$0xff]  ;;  %v782_v25 = vld [vmem:[#allocation10 + $0x88] sm:$0xff] }
 0x114   : > { %2813 = vmatpush1.bf16.msra.mxu0 %v2812_v10  ;;  %v777_v21 = vld [vmem:[#allocation10 + $0x60] sm:$0xff]  ;;  %v779_v24 = vld [vmem:[#allocation10 + $0x70] sm:$0xff]  ;;  %v786_v26 = vld [vmem:[#allocation10 + $0xa8] sm:$0xff] }
 0x115   : > { %2845 = vmatpush1.bf16.msra.mxu1 %v2844_v14  ;;  %v2816_v23 = vpack.c.bf16 %v777_v21, %v773_v20  ;;  %2815 = vmatprep.subr.bf16.mxu0 %v2814_v18  ;;  %v2848_v27 = vpack.c.bf16 %v779_v24, %v775_v22  ;;  %v2818_v28 = vpack.c.bf16 %v786_v26, %v782_v25  ;;  %v784_v29 = vld [vmem:[#allocation10 + $0x98] sm:$0xff]  ;;  %v781_v31 = vld [vmem:[#allocation10 + $0x80] sm:$0xff]  ;;  %v783_v34 = vld [vmem:[#allocation10 + $0x90] sm:$0xff] }
 0x116   : > { %2847 = vmatprep.subr.bf16.mxu1 %v2846_v19  ;;  %v788_v30 = vld [vmem:[#allocation10 + $0xb8] sm:$0xff]  ;;  %v785_v33 = vld [vmem:[#allocation10 + $0xa0] sm:$0xff]  ;;  %v787_v35 = vld [vmem:[#allocation10 + $0xb0] sm:$0xff] }
 0x117   : > { %v2850_v32 = vpack.c.bf16 %v788_v30, %v784_v29  ;;  %v2820_v36 = vpack.c.bf16 %v785_v33, %v781_v31  ;;  %v790_v37 = vld [vmem:[#allocation10 + $0xc8] sm:$0xff]  ;;  %v792_v39 = vld [vmem:[#allocation10 + $0xd8] sm:$0xff]  ;;  %v2852_v40 = vpack.c.bf16 %v787_v35, %v783_v34  ;;  %v789_v43 = vld [vmem:[#allocation10 + $0xc0] sm:$0xff] }
 0x118   : > { %2817 = vmatpush1.bf16.msra.mxu0 %v2816_v23  ;;  %v794_v38 = vld [vmem:[#allocation10 + $0xe8] sm:$0xff]  ;;  %v796_v42 = vld [vmem:[#allocation10 + $0xf8] sm:$0xff]  ;;  %v793_v44 = vld [vmem:[#allocation10 + $0xe0] sm:$0xff] }
 0x119   : > { %2849 = vmatpush1.bf16.msra.mxu1 %v2848_v27  ;;  %2819 = vmatprep.subr.bf16.mxu0 %v2818_v28  ;;  %v2822_v41 = vpack.c.bf16 %v794_v38, %v790_v37  ;;  %v2854_v45 = vpack.c.bf16 %v796_v42, %v792_v39  ;;  %v791_v46 = vld [vmem:[#allocation10 + $0xd0] sm:$0xff]  ;;  %v798_v48 = vld [vmem:[#allocation10 + $0x108] sm:$0xff]  ;;  %v800_v50 = vld [vmem:[#allocation10 + $0x118] sm:$0xff]  ;;  %v2824_v52 = vpack.c.bf16 %v793_v44, %v789_v43 }
 0x11a   : > { %2851 = vmatprep.subr.bf16.mxu1 %v2850_v32  ;;  %v795_v47 = vld [vmem:[#allocation10 + $0xf0] sm:$0xff]  ;;  %v802_v49 = vld [vmem:[#allocation10 + $0x128] sm:$0xff]  ;;  %v804_v51 = vld [vmem:[#allocation10 + $0x138] sm:$0xff] }
 0x11b   : > { %v2856_v53 = vpack.c.bf16 %v795_v47, %v791_v46  ;;  %v2826_v54 = vpack.c.bf16 %v802_v49, %v798_v48  ;;  %v797_v55 = vld [vmem:[#allocation10 + $0x100] sm:$0xff]  ;;  %v799_v57 = vld [vmem:[#allocation10 + $0x110] sm:$0xff]  ;;  %v2858_v58 = vpack.c.bf16 %v804_v51, %v800_v50  ;;  %v806_v60 = vld [vmem:[#allocation10 + $0x148] sm:$0xff] }
 0x11c   : > { %2821 = vmatpush1.bf16.msra.mxu0 %v2820_v36  ;;  %v801_v56 = vld [vmem:[#allocation10 + $0x120] sm:$0xff]  ;;  %v803_v59 = vld [vmem:[#allocation10 + $0x130] sm:$0xff]  ;;  %v810_v61 = vld [vmem:[#allocation10 + $0x168] sm:$0xff] }
 0x11d   : > { %2853 = vmatpush1.bf16.msra.mxu1 %v2852_v40  ;;  %2823 = vmatprep.subr.bf16.mxu0 %v2822_v41  ;;  %v808_v62 = vld [vmem:[#allocation10 + $0x158] sm:$0xff]  ;;  %v2828_v0 = vpack.c.bf16 %v801_v56, %v797_v55  ;;  %v2860_v1 = vpack.c.bf16 %v803_v59, %v799_v57  ;;  %v2830_v2 = vpack.c.bf16 %v810_v61, %v806_v60  ;;  %v805_v3 = vld [vmem:[#allocation10 + $0x140] sm:$0xff]  ;;  %v807_v5 = vld [vmem:[#allocation10 + $0x150] sm:$0xff] }
 0x11e   : > { %2855 = vmatprep.subr.bf16.mxu1 %v2854_v45  ;;  %v812_v63 = vld [vmem:[#allocation10 + $0x178] sm:$0xff]  ;;  %v809_v4 = vld [vmem:[#allocation10 + $0x160] sm:$0xff]  ;;  %v811_v7 = vld [vmem:[#allocation10 + $0x170] sm:$0xff] }
 0x11f   : > { %v2862_v6 = vpack.c.bf16 %v812_v63, %v808_v62  ;;  %v814_v9 = vld [vmem:[#allocation10 + $0x188] sm:$0xff]  ;;  %v816_v11 = vld [vmem:[#allocation10 + $0x198] sm:$0xff]  ;;  %v2832_v13 = vpack.c.bf16 %v809_v4, %v805_v3  ;;  %v2864_v14 = vpack.c.bf16 %v811_v7, %v807_v5  ;;  %v813_v16 = vld [vmem:[#allocation10 + $0x180] sm:$0xff] }
 0x120   : > { %2825 = vmatpush1.bf16.msra.mxu0 %v2824_v52  ;;  %v818_v10 = vld [vmem:[#allocation10 + $0x1a8] sm:$0xff]  ;;  %v820_v12 = vld [vmem:[#allocation10 + $0x1b8] sm:$0xff]  ;;  %v817_v17 = vld [vmem:[#allocation10 + $0x1a0] sm:$0xff] }
 0x121   : > { %2857 = vmatpush1.bf16.msra.mxu1 %v2856_v53  ;;  %2827 = vmatprep.subr.bf16.mxu0 %v2826_v54  ;;  %v2834_v15 = vpack.c.bf16 %v818_v10, %v814_v9  ;;  %v815_v18 = vld [vmem:[#allocation10 + $0x190] sm:$0xff]  ;;  %v2866_v19 = vpack.c.bf16 %v820_v12, %v816_v11  ;;  %v822_v21 = vld [vmem:[#allocation10 + $0x1c8] sm:$0xff]  ;;  %v824_v23 = vld [vmem:[#allocation10 + $0x1d8] sm:$0xff]  ;;  %v2836_v25 = vpack.c.bf16 %v817_v17, %v813_v16 }
 0x122   : > { %2859 = vmatprep.subr.bf16.mxu1 %v2858_v58  ;;  %v819_v20 = vld [vmem:[#allocation10 + $0x1b0] sm:$0xff]  ;;  %v826_v22 = vld [vmem:[#allocation10 + $0x1e8] sm:$0xff]  ;;  %v828_v24 = vld [vmem:[#allocation10 + $0x1f8] sm:$0xff] }
 0x123   : > { %v2868_v26 = vpack.c.bf16 %v819_v20, %v815_v18  ;;  %v2838_v27 = vpack.c.bf16 %v826_v22, %v822_v21  ;;  %v821_v28 = vld [vmem:[#allocation10 + $0x1c0] sm:$0xff]  ;;  %v823_v30 = vld [vmem:[#allocation10 + $0x1d0] sm:$0xff]  ;;  %v2870_v31 = vpack.c.bf16 %v828_v24, %v824_v23  ;;  %v701_v33 = vld [vmem:[#allocation8 + $0x8] sm:$0xff] }
 0x124   : > { %2829 = vmatpush1.bf16.msra.mxu0 %v2828_v0  ;;  %v825_v29 = vld [vmem:[#allocation10 + $0x1e0] sm:$0xff]  ;;  %v827_v32 = vld [vmem:[#allocation10 + $0x1f0] sm:$0xff]  ;;  %v705_v34 = vld [vmem:[#allocation8 + $0x28] sm:$0xff] }
 0x125   : > { %2861 = vmatpush1.bf16.msra.mxu1 %v2860_v1  ;;  %2831 = vmatprep.subr.bf16.mxu0 %v2830_v2  ;;  %v703_v35 = vld [vmem:[#allocation8 + $0x18] sm:$0xff]  ;;  %v2840_v37 = vpack.c.bf16 %v825_v29, %v821_v28  ;;  %v2872_v38 = vpack.c.bf16 %v827_v32, %v823_v30  ;;  %v2874_v39 = vpack.c.bf16 %v705_v34, %v701_v33  ;;  %v700_v40 = vld [vmem:[#allocation8] sm:$0xff]  ;;  %v702_v42 = vld [vmem:[#allocation8 + $0x10] sm:$0xff] }
 0x126   : > { %2863 = vmatprep.subr.bf16.mxu1 %v2862_v6  ;;  %v707_v36 = vld [vmem:[#allocation8 + $0x38] sm:$0xff]  ;;  %v704_v41 = vld [vmem:[#allocation8 + $0x20] sm:$0xff]  ;;  %v706_v44 = vld [vmem:[#allocation8 + $0x30] sm:$0xff] }
 0x127   : > { %v2906_v43 = vpack.c.bf16 %v707_v36, %v703_v35  ;;  %v709_v45 = vld [vmem:[#allocation8 + $0x48] sm:$0xff]  ;;  %v711_v47 = vld [vmem:[#allocation8 + $0x58] sm:$0xff]  ;;  %v764_v49 = vld [vmem:[#allocation2] sm:$0xff]  ;;  %v2876_v50 = vpack.c.bf16 %v704_v41, %v700_v40  ;;  %v2908_v51 = vpack.c.bf16 %v706_v44, %v702_v42 }
 0x128   : > { %2833 = vmatpush1.bf16.msra.mxu0 %v2832_v13  ;;  %v713_v46 = vld [vmem:[#allocation8 + $0x68] sm:$0xff]  ;;  %v715_v48 = vld [vmem:[#allocation8 + $0x78] sm:$0xff]  ;;  %v708_v53 = vld [vmem:[#allocation8 + $0x40] sm:$0xff] }
 0x129   : > { %2865 = vmatpush1.bf16.msra.mxu1 %v2864_v14  ;;  %2835 = vmatprep.subr.bf16.mxu0 %v2834_v15  ;;  %v2878_v52 = vpack.c.bf16 %v713_v46, %v709_v45  ;;  %v712_v54 = vld [vmem:[#allocation8 + $0x60] sm:$0xff]  ;;  %v710_v55 = vld [vmem:[#allocation8 + $0x50] sm:$0xff]  ;;  %v2910_v56 = vpack.c.bf16 %v715_v48, %v711_v47  ;;  %v717_v58 = vld [vmem:[#allocation8 + $0x88] sm:$0xff] }
 0x12a   : > { %2867 = vmatprep.subr.bf16.mxu1 %v2866_v19  ;;  %v714_v57 = vld [vmem:[#allocation8 + $0x70] sm:$0xff]  ;;  %v721_v59 = vld [vmem:[#allocation8 + $0xa8] sm:$0xff]  ;;  %v719_v60 = vld [vmem:[#allocation8 + $0x98] sm:$0xff]  ;;  %v2880_v62 = vpack.c.bf16 %v712_v54, %v708_v53 }
 0x12b   : > { %v723_v61 = vld [vmem:[#allocation8 + $0xb8] sm:$0xff]  ;;  %v2912_v63 = vpack.c.bf16 %v714_v57, %v710_v55  ;;  %v2882_v0 = vpack.c.bf16 %v721_v59, %v717_v58  ;;  %v716_v1 = vld [vmem:[#allocation8 + $0x80] sm:$0xff]  ;;  %v718_v3 = vld [vmem:[#allocation8 + $0x90] sm:$0xff] }
 0x12c   : > { %2837 = vmatpush1.bf16.msra.mxu0 %v2836_v25  ;;  %v720_v2 = vld [vmem:[#allocation8 + $0xa0] sm:$0xff]  ;;  %v2914_v4 = vpack.c.bf16 %v723_v61, %v719_v60  ;;  %v722_v5 = vld [vmem:[#allocation8 + $0xb0] sm:$0xff]  ;;  %v725_v6 = vld [vmem:[#allocation8 + $0xc8] sm:$0xff] }
 0x12d   : > { %2869 = vmatpush1.bf16.msra.mxu1 %v2868_v26  ;;  %2839 = vmatprep.subr.bf16.mxu0 %v2838_v27  ;;  %v729_v7 = vld [vmem:[#allocation8 + $0xe8] sm:$0xff]  ;;  %v727_v9 = vld [vmem:[#allocation8 + $0xd8] sm:$0xff]  ;;  %v2884_v11 = vpack.c.bf16 %v720_v2, %v716_v1  ;;  %v2916_v12 = vpack.c.bf16 %v722_v5, %v718_v3  ;;  %v724_v14 = vld [vmem:[#allocation8 + $0xc0] sm:$0xff] }
 0x12e   : > { %2871 = vmatprep.subr.bf16.mxu1 %v2870_v31  ;;  %v731_v10 = vld [vmem:[#allocation8 + $0xf8] sm:$0xff]  ;;  %v2886_v13 = vpack.c.bf16 %v729_v7, %v725_v6  ;;  %v728_v15 = vld [vmem:[#allocation8 + $0xe0] sm:$0xff]  ;;  %v726_v16 = vld [vmem:[#allocation8 + $0xd0] sm:$0xff] }
 0x12f   : > { %v2918_v17 = vpack.c.bf16 %v731_v10, %v727_v9  ;;  %v730_v18 = vld [vmem:[#allocation8 + $0xf0] sm:$0xff]  ;;  %v733_v19 = vld [vmem:[#allocation8 + $0x108] sm:$0xff]  ;;  %v735_v21 = vld [vmem:[#allocation8 + $0x118] sm:$0xff]  ;;  %v2888_v23 = vpack.c.bf16 %v728_v15, %v724_v14 }
 0x130   : > { %2841 = vmatpush1.bf16.msra.mxu0 %v2840_v37  ;;  %v737_v20 = vld [vmem:[#allocation8 + $0x128] sm:$0xff]  ;;  %v739_v22 = vld [vmem:[#allocation8 + $0x138] sm:$0xff]  ;;  %v2920_v24 = vpack.c.bf16 %v730_v18, %v726_v16  ;;  %v732_v26 = vld [vmem:[#allocation8 + $0x100] sm:$0xff] }
 0x131   : > { %2873 = vmatpush1.bf16.msra.mxu1 %v2872_v38  ;;  %2875 = vmatprep.subr.bf16.mxu0 %v2874_v39  ;;  %v2890_v25 = vpack.c.bf16 %v737_v20, %v733_v19  ;;  %v736_v27 = vld [vmem:[#allocation8 + $0x120] sm:$0xff]  ;;  %v734_v28 = vld [vmem:[#allocation8 + $0x110] sm:$0xff]  ;;  %v2922_v29 = vpack.c.bf16 %v739_v22, %v735_v21  ;;  %v741_v31 = vld [vmem:[#allocation8 + $0x148] sm:$0xff] }
 0x132   : > { %2907 = vmatprep.subr.bf16.mxu1 %v2906_v43  ;;  %v738_v30 = vld [vmem:[#allocation8 + $0x130] sm:$0xff]  ;;  %v745_v32 = vld [vmem:[#allocation8 + $0x168] sm:$0xff]  ;;  %v743_v33 = vld [vmem:[#allocation8 + $0x158] sm:$0xff]  ;;  %v2892_v35 = vpack.c.bf16 %v736_v27, %v732_v26 }
 0x133   : > { %894 = vmatmul.mubr.f32.vlgmr.msra.gmra.mrb[0].mxu0 %v764_v49  ;;  %v747_v34 = vld [vmem:[#allocation8 + $0x178] sm:$0xff]  ;;  %v2924_v36 = vpack.c.bf16 %v738_v30, %v734_v28  ;;  %v2894_v37 = vpack.c.bf16 %v745_v32, %v741_v31  ;;  %v740_v38 = vld [vmem:[#allocation8 + $0x140] sm:$0xff]  ;;  %v742_v40 = vld [vmem:[#allocation8 + $0x150] sm:$0xff] }
 0x134   : > { %965 = vmatmul.mubr.f32.vlgmr.msra.gmra.mrb[0].mxu1 %v764_v49  ;;  %2877 = vmatpush1.bf16.msra.mxu0 %v2876_v50  ;;  %v744_v39 = vld [vmem:[#allocation8 + $0x160] sm:$0xff]  ;;  %v2926_v41 = vpack.c.bf16 %v747_v34, %v743_v33  ;;  %v746_v42 = vld [vmem:[#allocation8 + $0x170] sm:$0xff]  ;;  %v749_v43 = vld [vmem:[#allocation8 + $0x188] sm:$0xff] }
 0x135   : > { %2909 = vmatpush1.bf16.msra.mxu1 %v2908_v51  ;;  %2879 = vmatprep.subr.bf16.mxu0 %v2878_v52  ;;  %v753_v44 = vld [vmem:[#allocation8 + $0x1a8] sm:$0xff]  ;;  %v751_v45 = vld [vmem:[#allocation8 + $0x198] sm:$0xff]  ;;  %v2896_v47 = vpack.c.bf16 %v744_v39, %v740_v38  ;;  %v2928_v48 = vpack.c.bf16 %v746_v42, %v742_v40  ;;  %v748_v50 = vld [vmem:[#allocation8 + $0x180] sm:$0xff] }
 0x136   : > { %2911 = vmatprep.subr.bf16.mxu1 %v2910_v56  ;;  %1035 = vmatprep.mubr.f32.mxu0 %v3768_v8  ;;  %v755_v46 = vld [vmem:[#allocation8 + $0x1b8] sm:$0xff]  ;;  %v2898_v49 = vpack.c.bf16 %v753_v44, %v749_v43  ;;  %v752_v51 = vld [vmem:[#allocation8 + $0x1a0] sm:$0xff]  ;;  %v750_v52 = vld [vmem:[#allocation8 + $0x190] sm:$0xff] }
 0x137   : > { %1106 = vmatprep.mubr.f32.mxu1 %v3768_v8  ;;  %v2930_v53 = vpack.c.bf16 %v755_v46, %v751_v45  ;;  %v754_v54 = vld [vmem:[#allocation8 + $0x1b0] sm:$0xff]  ;;  %v757_v55 = vld [vmem:[#allocation8 + $0x1c8] sm:$0xff]  ;;  %v759_v57 = vld [vmem:[#allocation8 + $0x1d8] sm:$0xff]  ;;  %v2900_v59 = vpack.c.bf16 %v752_v51, %v748_v50 }
 0x138   : > { %2881 = vmatpush1.bf16.msra.mxu0 %v2880_v62  ;;  %v761_v56 = vld [vmem:[#allocation8 + $0x1e8] sm:$0xff]  ;;  %v763_v58 = vld [vmem:[#allocation8 + $0x1f8] sm:$0xff]  ;;  %v2932_v60 = vpack.c.bf16 %v754_v54, %v750_v52  ;;  %v756_v62 = vld [vmem:[#allocation8 + $0x1c0] sm:$0xff] }
 0x139   : > { %2913 = vmatpush1.bf16.msra.mxu1 %v2912_v63  ;;  %2883 = vmatprep.subr.bf16.mxu0 %v2882_v0  ;;  %v2902_v61 = vpack.c.bf16 %v761_v56, %v757_v55  ;;  %v760_v63 = vld [vmem:[#allocation8 + $0x1e0] sm:$0xff]  ;;  %v758_v0 = vld [vmem:[#allocation8 + $0x1d0] sm:$0xff]  ;;  %v2934_v1 = vpack.c.bf16 %v763_v58, %v759_v57  ;;  %v1232_v3 = vld [vmem:[#allocation13 + $0x8] sm:$0xff] }
 0x13a   : > { %2915 = vmatprep.subr.bf16.mxu1 %v2914_v4  ;;  %v762_v2 = vld [vmem:[#allocation8 + $0x1f0] sm:$0xff]  ;;  %v1236_v4 = vld [vmem:[#allocation13 + $0x28] sm:$0xff]  ;;  %v1234_v5 = vld [vmem:[#allocation13 + $0x18] sm:$0xff]  ;;  %v2904_v7 = vpack.c.bf16 %v760_v63, %v756_v62 }
 0x13b   : > { %v1238_v6 = vld [vmem:[#allocation13 + $0x38] sm:$0xff]  ;;  %v2936_v9 = vpack.c.bf16 %v762_v2, %v758_v0  ;;  %v2938_v10 = vpack.c.bf16 %v1236_v4, %v1232_v3  ;;  %v1237_v15 = vld [vmem:[#allocation13 + $0x30] sm:$0xff]  ;;  %v1240_v16 = vld [vmem:[#allocation13 + $0x48] sm:$0xff] }
 0x13c   : > { %2885 = vmatpush1.bf16.msra.mxu0 %v2884_v11  ;;  %v1231_v11 = vld [vmem:[#allocation13] sm:$0xff]  ;;  %v2970_v14 = vpack.c.bf16 %v1238_v6, %v1234_v5  ;;  %v1242_v18 = vld [vmem:[#allocation13 + $0x58] sm:$0xff]  ;;  %v699_v20 = vld [vmem:[%s4155_s5] sm:$0xff] }
 0x13d   : > { %2917 = vmatpush1.bf16.msra.mxu1 %v2916_v12  ;;  %2887 = vmatprep.subr.bf16.mxu0 %v2886_v13  ;;  %v1235_v12 = vld [vmem:[#allocation13 + $0x20] sm:$0xff]  ;;  %v1233_v13 = vld [vmem:[#allocation13 + $0x10] sm:$0xff]  ;;  %v1246_v19 = vld [vmem:[#allocation13 + $0x78] sm:$0xff] }
 0x13e   : > { %2919 = vmatprep.subr.bf16.mxu1 %v2918_v17  ;;  %v1244_v17 = vld [vmem:[#allocation13 + $0x68] sm:$0xff]  ;;  %v2940_v21 = vpack.c.bf16 %v1235_v12, %v1231_v11  ;;  %v2972_v22 = vpack.c.bf16 %v1237_v15, %v1233_v13  ;;  %v1241_v26 = vld [vmem:[#allocation13 + $0x50] sm:$0xff]  ;;  %v2974_v27 = vpack.c.bf16 %v1246_v19, %v1242_v18  ;;  %v1250_v31 = vld [vmem:[#allocation13 + $0x98] sm:$0xff] }
 0x13f   : > { %v1245_v28 = vld [vmem:[#allocation13 + $0x70] sm:$0xff]  ;;  %v1252_v30 = vld [vmem:[#allocation13 + $0xa8] sm:$0xff]  ;;  %v1254_v32 = vld [vmem:[#allocation13 + $0xb8] sm:$0xff] }
 0x140   : > { %2889 = vmatpush1.bf16.msra.mxu0 %v2888_v23  ;;  %v2942_v23 = vpack.c.bf16 %v1244_v17, %v1240_v16  ;;  %v2976_v34 = vpack.c.bf16 %v1245_v28, %v1241_v26  ;;  %v1249_v38 = vld [vmem:[#allocation13 + $0x90] sm:$0xff]  ;;  %v2978_v39 = vpack.c.bf16 %v1254_v32, %v1250_v31  ;;  %v1260_v42 = vld [vmem:[#allocation13 + $0xe8] sm:$0xff]  ;;  %v1258_v43 = vld [vmem:[#allocation13 + $0xd8] sm:$0xff] }
 0x141   : > { %2921 = vmatpush1.bf16.msra.mxu1 %v2920_v24  ;;  %2891 = vmatprep.subr.bf16.mxu0 %v2890_v25  ;;  %v1239_v24 = vld [vmem:[#allocation13 + $0x40] sm:$0xff]  ;;  %v1253_v40 = vld [vmem:[#allocation13 + $0xb0] sm:$0xff]  ;;  %v1262_v44 = vld [vmem:[#allocation13 + $0xf8] sm:$0xff] }
 0x142   : > { %2923 = vmatprep.subr.bf16.mxu1 %v2922_v29  ;;  %v1243_v25 = vld [vmem:[#allocation13 + $0x60] sm:$0xff]  ;;  %v1248_v29 = vld [vmem:[#allocation13 + $0x88] sm:$0xff]  ;;  %v2980_v46 = vpack.c.bf16 %v1253_v40, %v1249_v38  ;;  %v2982_v50 = vpack.c.bf16 %v1262_v44, %v1258_v43  ;;  %v1257_v51 = vld [vmem:[#allocation13 + $0xd0] sm:$0xff] }
 0x143   : > { %v2944_v33 = vpack.c.bf16 %v1243_v25, %v1239_v24  ;;  %v1261_v52 = vld [vmem:[#allocation13 + $0xf0] sm:$0xff]  ;;  %v1264_v55 = vld [vmem:[#allocation13 + $0x108] sm:$0xff]  ;;  %v1266_v58 = vld [vmem:[#allocation13 + $0x118] sm:$0xff] }
 0x144   : > { %2893 = vmatpush1.bf16.msra.mxu0 %v2892_v35  ;;  %v2946_v35 = vpack.c.bf16 %v1252_v30, %v1248_v29  ;;  %v2984_v54 = vpack.c.bf16 %v1261_v52, %v1257_v51  ;;  %v1268_v56 = vld [vmem:[#allocation13 + $0x128] sm:$0xff]  ;;  %v1267_v62 = vld [vmem:[#allocation13 + $0x120] sm:$0xff]  ;;  %v1265_v63 = vld [vmem:[#allocation13 + $0x110] sm:$0xff] }
 0x145   : > { %2925 = vmatpush1.bf16.msra.mxu1 %v2924_v36  ;;  %2895 = vmatprep.subr.bf16.mxu0 %v2894_v37  ;;  %v1247_v36 = vld [vmem:[#allocation13 + $0x80] sm:$0xff]  ;;  %v2954_v57 = vpack.c.bf16 %v1268_v56, %v1264_v55  ;;  %v1269_v0 = vld [vmem:[#allocation13 + $0x130] sm:$0xff]  ;;  %v1272_v3 = vld [vmem:[#allocation13 + $0x148] sm:$0xff] }
 0x146   : > { %2927 = vmatprep.subr.bf16.mxu1 %v2926_v41  ;;  %v1251_v37 = vld [vmem:[#allocation13 + $0xa0] sm:$0xff]  ;;  %v1256_v41 = vld [vmem:[#allocation13 + $0xc8] sm:$0xff]  ;;  %v2988_v2 = vpack.c.bf16 %v1269_v0, %v1265_v63  ;;  %v1274_v5 = vld [vmem:[#allocation13 + $0x158] sm:$0xff] }
 0x147   : > { %v2948_v45 = vpack.c.bf16 %v1251_v37, %v1247_v36  ;;  %v1276_v4 = vld [vmem:[#allocation13 + $0x168] sm:$0xff]  ;;  %v1273_v13 = vld [vmem:[#allocation13 + $0x150] sm:$0xff]  ;;  %v1282_v18 = vld [vmem:[#allocation13 + $0x198] sm:$0xff] }
 0x148   : > { %2897 = vmatpush1.bf16.msra.mxu0 %v2896_v47  ;;  %v2950_v47 = vpack.c.bf16 %v1260_v42, %v1256_v41  ;;  %v2958_v6 = vpack.c.bf16 %v1276_v4, %v1272_v3  ;;  %v1280_v16 = vld [vmem:[#allocation13 + $0x188] sm:$0xff]  ;;  %v1281_v25 = vld [vmem:[#allocation13 + $0x190] sm:$0xff]  ;;  %v1290_v30 = vld [vmem:[#allocation13 + $0x1d8] sm:$0xff] }
 0x149   : > { %2929 = vmatpush1.bf16.msra.mxu1 %v2928_v48  ;;  %2899 = vmatprep.subr.bf16.mxu0 %v2898_v49  ;;  %v1255_v48 = vld [vmem:[#allocation13 + $0xc0] sm:$0xff]  ;;  %v1284_v17 = vld [vmem:[#allocation13 + $0x1a8] sm:$0xff]  ;;  %v1285_v26 = vld [vmem:[#allocation13 + $0x1b0] sm:$0xff] }
 0x14a   : > { %2931 = vmatprep.subr.bf16.mxu1 %v2930_v53  ;;  %v1259_v49 = vld [vmem:[#allocation13 + $0xe0] sm:$0xff]  ;;  %v2962_v19 = vpack.c.bf16 %v1284_v17, %v1280_v16  ;;  %v1288_v28 = vld [vmem:[#allocation13 + $0x1c8] sm:$0xff]  ;;  %v1294_v32 = vld [vmem:[#allocation13 + $0x1f8] sm:$0xff] }
 0x14b   : > { %v2952_v53 = vpack.c.bf16 %v1259_v49, %v1255_v48  ;;  %v1292_v29 = vld [vmem:[#allocation13 + $0x1e8] sm:$0xff]  ;;  %v1289_v37 = vld [vmem:[#allocation13 + $0x1d0] sm:$0xff]  ;;  %v1169_v42 = vld [vmem:[#allocation12 + $0x18] sm:$0xff] }
 0x14c   : > { %2901 = vmatpush1.bf16.msra.mxu0 %v2900_v59  ;;  %v1270_v59 = vld [vmem:[#allocation13 + $0x138] sm:$0xff]  ;;  %v2966_v31 = vpack.c.bf16 %v1292_v29, %v1288_v28  ;;  %v1293_v38 = vld [vmem:[#allocation13 + $0x1f0] sm:$0xff]  ;;  %v1167_v40 = vld [vmem:[#allocation12 + $0x8] sm:$0xff] }
 0x14d   : > { %2933 = vmatpush1.bf16.msra.mxu1 %v2932_v60  ;;  %2903 = vmatprep.subr.bf16.mxu0 %v2902_v61  ;;  %v1263_v60 = vld [vmem:[#allocation13 + $0x100] sm:$0xff]  ;;  %v2986_v61 = vpack.c.bf16 %v1270_v59, %v1266_v58  ;;  %v1171_v41 = vld [vmem:[#allocation12 + $0x28] sm:$0xff]  ;;  %v1173_v44 = vld [vmem:[#allocation12 + $0x38] sm:$0xff] }
 0x14e   : > { %2935 = vmatprep.subr.bf16.mxu1 %v2934_v1  ;;  %v2956_v1 = vpack.c.bf16 %v1267_v62, %v1263_v60  ;;  %v3002_v43 = vpack.c.bf16 %v1171_v41, %v1167_v40  ;;  %v1168_v49 = vld [vmem:[#allocation12 + $0x10] sm:$0xff]  ;;  %v1230_v51 = vld [vmem:[#allocation4] sm:$0xff]  ;;  %v1177_v55 = vld [vmem:[#allocation12 + $0x58] sm:$0xff] }
 0x14f   : > { %v1174_v58 = vld [vmem:[#allocation12 + $0x40] sm:$0xff]  ;;  %v1176_v62 = vld [vmem:[#allocation12 + $0x50] sm:$0xff]  ;;  %v1185_v3 = vld [vmem:[#allocation12 + $0x98] sm:$0xff] }
 0x150   : > { %2905 = vmatpush1.bf16.msra.mxu0 %v2904_v7  ;;  %v1278_v7 = vld [vmem:[#allocation13 + $0x178] sm:$0xff]  ;;  %v1178_v59 = vld [vmem:[#allocation12 + $0x60] sm:$0xff]  ;;  %v1180_v63 = vld [vmem:[#allocation12 + $0x70] sm:$0xff] }
 0x151   : > { %2937 = vmatpush1.bf16.msra.mxu1 %v2936_v9  ;;  %2939 = vmatprep.subr.bf16.mxu0 %v2938_v10  ;;  %v1271_v9 = vld [vmem:[#allocation13 + $0x140] sm:$0xff]  ;;  %v2990_v11 = vpack.c.bf16 %v1278_v7, %v1274_v5  ;;  %v3040_v0 = vpack.c.bf16 %v1180_v63, %v1176_v62  ;;  %v1189_v5 = vld [vmem:[#allocation12 + $0xb8] sm:$0xff]  ;;  %v1227_v62 = vld [vmem:[#allocation12 + $0x1e8] sm:$0xff] }
 0x152   : > { %2971 = vmatprep.subr.bf16.mxu1 %v2970_v14  ;;  %v1275_v10 = vld [vmem:[#allocation13 + $0x160] sm:$0xff]  ;;  %v1277_v14 = vld [vmem:[#allocation13 + $0x170] sm:$0xff]  ;;  %v1193_v16 = vld [vmem:[#allocation12 + $0xd8] sm:$0xff] }
 0x153   : > { %1036 = vmatmul.mubr.f32.vlgmr.msra.gmra.mrb[0].mxu0 %v699_v20  ;;  %v2960_v12 = vpack.c.bf16 %v1275_v10, %v1271_v9  ;;  %v2992_v15 = vpack.c.bf16 %v1277_v14, %v1273_v13  ;;  %v1186_v7 = vld [vmem:[#allocation12 + $0xa0] sm:$0xff]  ;;  %v3042_v9 = vpack.c.bf16 %v1189_v5, %v1185_v3  ;;  %v1191_v14 = vld [vmem:[#allocation12 + $0xc8] sm:$0xff]  ;;  %v1201_v29 = vld [vmem:[#allocation12 + $0x118] sm:$0xff] }
 0x154   : > { %1107 = vmatmul.mubr.f32.vlgmr.msra.gmra.mrb[0].mxu1 %v699_v20  ;;  %2941 = vmatpush1.bf16.msra.mxu0 %v2940_v21  ;;  %v1286_v20 = vld [vmem:[#allocation13 + $0x1b8] sm:$0xff]  ;;  %v1279_v21 = vld [vmem:[#allocation13 + $0x180] sm:$0xff] }
 0x155   : > { %2973 = vmatpush1.bf16.msra.mxu1 %v2972_v22  ;;  %2943 = vmatprep.subr.bf16.mxu0 %v2942_v23  ;;  %v1283_v22 = vld [vmem:[#allocation13 + $0x1a0] sm:$0xff]  ;;  %v2994_v23 = vpack.c.bf16 %v1286_v20, %v1282_v18  ;;  %v1197_v18 = vld [vmem:[#allocation12 + $0xf8] sm:$0xff] }
 0x156   : > { %2975 = vmatprep.subr.bf16.mxu1 %v2974_v27  ;;  %1359 = vmatprep.mubr.f32.mxu0 %v3768_v8  ;;  %v2964_v24 = vpack.c.bf16 %v1283_v22, %v1279_v21  ;;  %v2996_v27 = vpack.c.bf16 %v1285_v26, %v1281_v25  ;;  %v1194_v20 = vld [vmem:[#allocation12 + $0xe0] sm:$0xff]  ;;  %v3046_v21 = vpack.c.bf16 %v1197_v18, %v1193_v16  ;;  %v1199_v26 = vld [vmem:[#allocation12 + $0x108] sm:$0xff]  ;;  %v1209_v40 = vld [vmem:[#allocation12 + $0x158] sm:$0xff] }
 0x157   : > { %1430 = vmatprep.mubr.f32.mxu1 %v3768_v8  ;;  %v1222_v3 = vld [vmem:[#allocation12 + $0x1c0] sm:$0xff] }
 0x158   : > { %2945 = vmatpush1.bf16.msra.mxu0 %v2944_v33  ;;  %v1287_v33 = vld [vmem:[#allocation13 + $0x1c0] sm:$0xff] }
 0x159   : > { %2977 = vmatpush1.bf16.msra.mxu1 %v2976_v34  ;;  %2947 = vmatprep.subr.bf16.mxu0 %v2946_v35  ;;  %v1291_v34 = vld [vmem:[#allocation13 + $0x1e0] sm:$0xff]  ;;  %v2998_v35 = vpack.c.bf16 %v1294_v32, %v1290_v30  ;;  %v1205_v30 = vld [vmem:[#allocation12 + $0x138] sm:$0xff] }
 0x15a   : > { %2979 = vmatprep.subr.bf16.mxu1 %v2978_v39  ;;  %v2968_v36 = vpack.c.bf16 %v1291_v34, %v1287_v33  ;;  %v3000_v39 = vpack.c.bf16 %v1293_v38, %v1289_v37  ;;  %v3050_v32 = vpack.c.bf16 %v1205_v30, %v1201_v29  ;;  %v1202_v33 = vld [vmem:[#allocation12 + $0x120] sm:$0xff]  ;;  %v1200_v34 = vld [vmem:[#allocation12 + $0x110] sm:$0xff]  ;;  %v1207_v38 = vld [vmem:[#allocation12 + $0x148] sm:$0xff] }
 0x15b   : > { %v1226_v5 = vld [vmem:[#allocation12 + $0x1e0] sm:$0xff] }
 0x15c   : > { %2949 = vmatpush1.bf16.msra.mxu0 %v2948_v45  ;;  %v1166_v45 = vld [vmem:[#allocation12] sm:$0xff] }
 0x15d   : > { %2981 = vmatpush1.bf16.msra.mxu1 %v2980_v46  ;;  %2951 = vmatprep.subr.bf16.mxu0 %v2950_v47  ;;  %v1170_v46 = vld [vmem:[#allocation12 + $0x20] sm:$0xff]  ;;  %v3034_v47 = vpack.c.bf16 %v1173_v44, %v1169_v42  ;;  %v1213_v42 = vld [vmem:[#allocation12 + $0x178] sm:$0xff] }
 0x15e   : > { %2983 = vmatprep.subr.bf16.mxu1 %v2982_v50  ;;  %v3004_v48 = vpack.c.bf16 %v1170_v46, %v1166_v45  ;;  %v1172_v50 = vld [vmem:[#allocation12 + $0x30] sm:$0xff]  ;;  %v1210_v44 = vld [vmem:[#allocation12 + $0x160] sm:$0xff]  ;;  %v3054_v45 = vpack.c.bf16 %v1213_v42, %v1209_v40 }
 0x15f   : > { %v3036_v52 = vpack.c.bf16 %v1172_v50, %v1168_v49  ;;  %v1215_v49 = vld [vmem:[#allocation12 + $0x188] sm:$0xff] }
 0x160   : > { %2953 = vmatpush1.bf16.msra.mxu0 %v2952_v53  ;;  %v1175_v53 = vld [vmem:[#allocation12 + $0x48] sm:$0xff] }
 0x161   : > { %2985 = vmatpush1.bf16.msra.mxu1 %v2984_v54  ;;  %2955 = vmatprep.subr.bf16.mxu0 %v2954_v57  ;;  %v1179_v54 = vld [vmem:[#allocation12 + $0x68] sm:$0xff]  ;;  %v1181_v57 = vld [vmem:[#allocation12 + $0x78] sm:$0xff] }
 0x162   : > { %2987 = vmatprep.subr.bf16.mxu1 %v2986_v61  ;;  %v3006_v56 = vpack.c.bf16 %v1179_v54, %v1175_v53  ;;  %v3038_v60 = vpack.c.bf16 %v1181_v57, %v1177_v55  ;;  %v3008_v61 = vpack.c.bf16 %v1178_v59, %v1174_v58  ;;  %v1221_v53 = vld [vmem:[#allocation12 + $0x1b8] sm:$0xff]  ;;  %v1218_v57 = vld [vmem:[#allocation12 + $0x1a0] sm:$0xff]  ;;  %v1216_v58 = vld [vmem:[#allocation12 + $0x190] sm:$0xff] }
 0x164   : > { %2957 = vmatpush1.bf16.msra.mxu0 %v2956_v1  ;;  %v1183_v1 = vld [vmem:[#allocation12 + $0x88] sm:$0xff] }
 0x165   : > { %2989 = vmatpush1.bf16.msra.mxu1 %v2988_v2  ;;  %2959 = vmatprep.subr.bf16.mxu0 %v2958_v6  ;;  %v1187_v2 = vld [vmem:[#allocation12 + $0xa8] sm:$0xff]  ;;  %v1182_v6 = vld [vmem:[#allocation12 + $0x80] sm:$0xff] }
 0x166   : > { %2991 = vmatprep.subr.bf16.mxu1 %v2990_v11  ;;  %v3010_v4 = vpack.c.bf16 %v1187_v2, %v1183_v1  ;;  %v3012_v10 = vpack.c.bf16 %v1186_v7, %v1182_v6  ;;  %v1184_v11 = vld [vmem:[#allocation12 + $0x90] sm:$0xff]  ;;  %v1225_v1 = vld [vmem:[#allocation12 + $0x1d8] sm:$0xff] }
 0x167   : > { %v1229_v2 = vld [vmem:[#allocation12 + $0x1f8] sm:$0xff]  ;;  %v1224_v6 = vld [vmem:[#allocation12 + $0x1d0] sm:$0xff] }
 0x168   : > { %2961 = vmatpush1.bf16.msra.mxu0 %v2960_v12  ;;  %v1188_v12 = vld [vmem:[#allocation12 + $0xb0] sm:$0xff] }
 0x169   : > { %2993 = vmatpush1.bf16.msra.mxu1 %v2992_v15  ;;  %2963 = vmatprep.subr.bf16.mxu0 %v2962_v19  ;;  %v3044_v13 = vpack.c.bf16 %v1188_v12, %v1184_v11  ;;  %v1195_v15 = vld [vmem:[#allocation12 + $0xe8] sm:$0xff]  ;;  %v1190_v19 = vld [vmem:[#allocation12 + $0xc0] sm:$0xff]  ;;  %v1228_v7 = vld [vmem:[#allocation12 + $0x1f0] sm:$0xff] }
 0x16a   : > { %2995 = vmatprep.subr.bf16.mxu1 %v2994_v23  ;;  %v3014_v17 = vpack.c.bf16 %v1195_v15, %v1191_v14  ;;  %v3016_v22 = vpack.c.bf16 %v1194_v20, %v1190_v19  ;;  %v1192_v23 = vld [vmem:[#allocation12 + $0xd0] sm:$0xff]  ;;  %v1698_v11 = vld [vmem:[#allocation16 + $0x8] sm:$0xff]  ;;  %v1704_v15 = vld [vmem:[#allocation16 + $0x38] sm:$0xff] }
 0x16b   : > { %v1702_v12 = vld [vmem:[#allocation16 + $0x28] sm:$0xff]  ;;  %v1113_v20 = vld [vmem:[%s4344_s3] sm:$0xf] }
 0x16c   : > { %2965 = vmatpush1.bf16.msra.mxu0 %v2964_v24  ;;  %v1196_v24 = vld [vmem:[#allocation12 + $0xf0] sm:$0xff]  ;;  %v3066_v14 = vpack.c.bf16 %v1702_v12, %v1698_v11  ;;  %v1714_v11 = vld [vmem:[#allocation16 + $0x88] sm:$0xff] }
 0x16d   : > { %2997 = vmatpush1.bf16.msra.mxu1 %v2996_v27  ;;  %2967 = vmatprep.subr.bf16.mxu0 %v2966_v31  ;;  %v3048_v25 = vpack.c.bf16 %v1196_v24, %v1192_v23  ;;  %v1203_v27 = vld [vmem:[#allocation12 + $0x128] sm:$0xff]  ;;  %v1198_v31 = vld [vmem:[#allocation12 + $0x100] sm:$0xff] }
 0x16e   : > { %2999 = vmatprep.subr.bf16.mxu1 %v2998_v35  ;;  %v3018_v28 = vpack.c.bf16 %v1203_v27, %v1199_v26  ;;  %v1204_v35 = vld [vmem:[#allocation12 + $0x130] sm:$0xff]  ;;  %v1718_v12 = vld [vmem:[#allocation16 + $0xa8] sm:$0xff] }
 0x16f   : > { %v3052_v37 = vpack.c.bf16 %v1204_v35, %v1200_v34 }
 0x170   : > { %2969 = vmatpush1.bf16.msra.mxu0 %v2968_v36  ;;  %v3020_v36 = vpack.c.bf16 %v1202_v33, %v1198_v31 }
 0x171   : > { %3001 = vmatpush1.bf16.msra.mxu1 %v3000_v39  ;;  %3003 = vmatprep.subr.bf16.mxu0 %v3002_v43  ;;  %v1211_v39 = vld [vmem:[#allocation12 + $0x168] sm:$0xff]  ;;  %v1206_v43 = vld [vmem:[#allocation12 + $0x140] sm:$0xff] }
 0x172   : > { %3035 = vmatprep.subr.bf16.mxu1 %v3034_v47  ;;  %v3022_v41 = vpack.c.bf16 %v1211_v39, %v1207_v38  ;;  %v3024_v46 = vpack.c.bf16 %v1210_v44, %v1206_v43  ;;  %v1208_v47 = vld [vmem:[#allocation12 + $0x150] sm:$0xff] }
 0x173   : > { %1360 = vmatmul.mubr.f32.vlgmr.msra.gmra.mrb[2].mxu0 %v1230_v51 }
 0x174   : > { %1431 = vmatmul.mubr.f32.vlgmr.msra.gmra.mrb[2].mxu1 %v1230_v51  ;;  %3005 = vmatpush1.bf16.msra.mxu0 %v3004_v48  ;;  %v1212_v48 = vld [vmem:[#allocation12 + $0x170] sm:$0xff]  ;;  %v1219_v51 = vld [vmem:[#allocation12 + $0x1a8] sm:$0xff] }
 0x175   : > { %3037 = vmatpush1.bf16.msra.mxu1 %v3036_v52  ;;  %1501 = vmatprep.mubr.f32.mxu0 %v3768_v8  ;;  %v3056_v50 = vpack.c.bf16 %v1212_v48, %v1208_v47  ;;  %v1217_v52 = vld [vmem:[#allocation12 + $0x198] sm:$0xff]  ;;  %v3026_v54 = vpack.c.bf16 %v1219_v51, %v1215_v49 }
 0x176   : > { %3007 = vmatprep.subr.bf16.mxu0 %v3006_v56  ;;  %1572 = vmatprep.mubr.f32.mxu1 %v3768_v8  ;;  %v3058_v55 = vpack.c.bf16 %v1221_v53, %v1217_v52  ;;  %v1214_v56 = vld [vmem:[#allocation12 + $0x180] sm:$0xff]  ;;  %v1158_v48 = vld [vmem:[#allocation3] sm:$0xff] }
 0x177   : > { %3039 = vmatprep.subr.bf16.mxu1 %v3038_v60  ;;  %v3028_v59 = vpack.c.bf16 %v1218_v57, %v1214_v56  ;;  %v1220_v60 = vld [vmem:[#allocation12 + $0x1b0] sm:$0xff]  ;;  %v1701_v56 = vld [vmem:[#allocation16 + $0x20] sm:$0xff] }
 0x178   : > { %3009 = vmatpush1.bf16.msra.mxu0 %v3008_v61  ;;  %v1223_v61 = vld [vmem:[#allocation12 + $0x1c8] sm:$0xff]  ;;  %v3060_v63 = vpack.c.bf16 %v1220_v60, %v1216_v58  ;;  %v1699_v57 = vld [vmem:[#allocation16 + $0x10] sm:$0xff] }
 0x179   : > { %3041 = vmatpush1.bf16.msra.mxu1 %v3040_v0  ;;  %3011 = vmatprep.subr.bf16.mxu0 %v3010_v4  ;;  %v3030_v0 = vpack.c.bf16 %v1227_v62, %v1223_v61  ;;  %v3062_v4 = vpack.c.bf16 %v1229_v2, %v1225_v1  ;;  %v1703_v58 = vld [vmem:[#allocation16 + $0x30] sm:$0xff]  ;;  %v1710_v60 = vld [vmem:[#allocation16 + $0x68] sm:$0xff]  ;;  %v1708_v61 = vld [vmem:[#allocation16 + $0x58] sm:$0xff] }
 0x17a   : > { %3043 = vmatprep.subr.bf16.mxu1 %v3042_v9  ;;  %v3032_v9 = vpack.c.bf16 %v1226_v5, %v1222_v3  ;;  %v1712_v62 = vld [vmem:[#allocation16 + $0x78] sm:$0xff]  ;;  %v3100_v2 = vpack.c.bf16 %v1703_v58, %v1699_v57  ;;  %v1705_v3 = vld [vmem:[#allocation16 + $0x40] sm:$0xff] }
 0x17b   : > { %v1744_v57 = vld [vmem:[#allocation16 + $0x178] sm:$0xff]  ;;  %v1737_v58 = vld [vmem:[#allocation16 + $0x140] sm:$0xff] }
 0x17c   : > { %3013 = vmatpush1.bf16.msra.mxu0 %v3012_v10  ;;  %v3064_v10 = vpack.c.bf16 %v1228_v7, %v1224_v6  ;;  %v3102_v7 = vpack.c.bf16 %v1712_v62, %v1708_v61  ;;  %v1739_v62 = vld [vmem:[#allocation16 + $0x150] sm:$0xff] }
 0x17d   : > { %3045 = vmatpush1.bf16.msra.mxu1 %v3044_v13  ;;  %3015 = vmatprep.subr.bf16.mxu0 %v3014_v17  ;;  %v1700_v13 = vld [vmem:[#allocation16 + $0x18] sm:$0xff]  ;;  %v1115_v17 = vlaneseq }
 0x17e   : > { %3047 = vmatprep.subr.bf16.mxu1 %v3046_v21  ;;  %v3098_v16 = vpack.c.bf16 %v1704_v15, %v1700_v13  ;;  %v1716_v13 = vld [vmem:[#allocation16 + $0x98] sm:$0xff] }
 0x17f   : > { %v1116_v18 = vshrl.u32 %v1115_v17, 7  ;;  %v1713_v17 = vld [vmem:[#allocation16 + $0x80] sm:$0xff] }
 0x180   : > { %3017 = vmatpush1.bf16.msra.mxu0 %v3016_v22 }
 0x181   : > { %3049 = vmatpush1.bf16.msra.mxu1 %v3048_v25  ;;  %3019 = vmatprep.subr.bf16.mxu0 %v3018_v28  ;;  %v4168_v19 = vsub.s32 0, %v1116_v18  ;;  %v4173_v21 = vsub.s32 1, %v1116_v18  ;;  %v4177_v24 = vsub.s32 3, %v1116_v18 }
 0x182   : > { %3051 = vmatprep.subr.bf16.mxu1 %v3050_v32 }
 0x183   : > { %v1118_v22 = vrot.slane %v1113_v20, %v4168_v19  ;;  %v1122_v23 = vrot.slane %v1113_v20, %v4173_v21  ;;  %v1130_v31 = vrot.slane %v1113_v20, %v4177_v24 }
 0x184   : > { %3021 = vmatpush1.bf16.msra.mxu0 %v3020_v36 }
 0x185   : > { %3053 = vmatpush1.bf16.msra.mxu1 %v3052_v37  ;;  %3023 = vmatprep.subr.bf16.mxu0 %v3022_v41  ;;  %v4180_v37 = vsub.s32 2, %v1116_v18  ;;  %v1717_v18 = vld [vmem:[#allocation16 + $0xa0] sm:$0xff] }
 0x186   : > { %3055 = vmatprep.subr.bf16.mxu1 %v3054_v45 }
 0x187   : > { %v1126_v39 = vrot.slane %v1113_v20, %v4180_v37  ;;  %v3074_v20 = vpack.c.bf16 %v1718_v12, %v1714_v11  ;;  %v1747_v11 = vld [vmem:[#allocation16 + $0x190] sm:$0xff] }
 0x188   : > { %3025 = vmatpush1.bf16.msra.mxu0 %v3024_v46  ;;  %v1751_v12 = vld [vmem:[#allocation16 + $0x1b0] sm:$0xff] }
 0x189   : > { %3057 = vmatpush1.bf16.msra.mxu1 %v3056_v50  ;;  %3027 = vmatprep.subr.bf16.mxu0 %v3026_v54 }
 0x18a   : > { %3059 = vmatprep.subr.bf16.mxu1 %v3058_v55  ;;  %v1697_v55 = vld [vmem:[#allocation16] sm:$0xff] }
 0x18b   : > { %v3068_v1 = vpack.c.bf16 %v1701_v56, %v1697_v55  ;;  %v1740_v55 = vld [vmem:[#allocation16 + $0x158] sm:$0xff] }
 0x18c   : > { %3029 = vmatpush1.bf16.msra.mxu0 %v3028_v59  ;;  %v1706_v59 = vld [vmem:[#allocation16 + $0x48] sm:$0xff] }
 0x18d   : > { %3061 = vmatpush1.bf16.msra.mxu1 %v3060_v63  ;;  %3031 = vmatprep.subr.bf16.mxu0 %v3030_v0  ;;  %v3070_v6 = vpack.c.bf16 %v1710_v60, %v1706_v59  ;;  %v1741_v59 = vld [vmem:[#allocation16 + $0x160] sm:$0xff]  ;;  %v3118_v60 = vpack.c.bf16 %v1744_v57, %v1740_v55  ;;  %v1649_v55 = vld [vmem:[#allocation15 + $0x88] sm:$0xff]  ;;  %v1651_v57 = vld [vmem:[#allocation15 + $0x98] sm:$0xff] }
 0x18e   : > { %3063 = vmatprep.subr.bf16.mxu1 %v3062_v4  ;;  %v1709_v4 = vld [vmem:[#allocation16 + $0x60] sm:$0xff]  ;;  %v3088_v61 = vpack.c.bf16 %v1741_v59, %v1737_v58  ;;  %v1655_v59 = vld [vmem:[#allocation15 + $0xb8] sm:$0xff] }
 0x18f   : > { %v3072_v15 = vpack.c.bf16 %v1709_v4, %v1705_v3  ;;  %v1748_v3 = vld [vmem:[#allocation16 + $0x198] sm:$0xff] }
 0x190   : > { %3033 = vmatpush1.bf16.msra.mxu0 %v3032_v9  ;;  %v1707_v9 = vld [vmem:[#allocation16 + $0x50] sm:$0xff] }
 0x191   : > { %3065 = vmatpush1.bf16.msra.mxu1 %v3064_v10  ;;  %3067 = vmatprep.subr.bf16.mxu0 %v3066_v14  ;;  %v1711_v10 = vld [vmem:[#allocation16 + $0x70] sm:$0xff]  ;;  %v1720_v14 = vld [vmem:[#allocation16 + $0xb8] sm:$0xff] }
 0x192   : > { %3099 = vmatprep.subr.bf16.mxu1 %v3098_v16  ;;  %v3104_v16 = vpack.c.bf16 %v1711_v10, %v1707_v9 }
 0x226   : > { %v1037_v25 = vpop.f32.mrb[0].mxu0 }
 0x227   : > { %v1135_v26 = vadd.f32 %v1118_v22, %v1037_v25  ;;  %v1108_v27 = vpop.f32.mrb[0].mxu1  ;;  %v1039_v28 = vpop.f32.mrb[1].mxu0  ;;  %v3106_v22 = vpack.c.bf16 %v1720_v14, %v1716_v13  ;;  %v1719_v25 = vld [vmem:[#allocation16 + $0xb0] sm:$0xff]  ;;  %v3124_v13 = vpack.c.bf16 %v1751_v12, %v1747_v11  ;;  %v1754_v14 = vld [vmem:[#allocation16 + $0x1c8] sm:$0xff] }
 0x228   : > { %v1136_v29 = vadd.f32 %v1122_v23, %v1039_v28  ;;  %v1110_v30 = vpop.f32.mrb[1].mxu1  ;;  %v1137_v41 = vadd.f32 %v1126_v39, %v1108_v27  ;;  %v1715_v23 = vld [vmem:[#allocation16 + $0x90] sm:$0xff]  ;;  %v1726_v27 = vld [vmem:[#allocation16 + $0xe8] sm:$0xff]  ;;  %v1724_v28 = vld [vmem:[#allocation16 + $0xd8] sm:$0xff] }
 0x229   : > { %v1139_v32 = vsub.f32 0.0, %v1135_v26  ;;  %v1138_v36 = vadd.f32 %v1130_v31, %v1110_v30  ;;  %v1722_v26 = vld [vmem:[#allocation16 + $0xc8] sm:$0xff]  ;;  %v3076_v30 = vpack.c.bf16 %v1717_v18, %v1713_v17  ;;  %v3108_v31 = vpack.c.bf16 %v1719_v25, %v1715_v23  ;;  %v1760_v18 = vld [vmem:[#allocation16 + $0x1f8] sm:$0xff]  ;;  %v1658_v12 = vld [vmem:[#allocation15 + $0xd0] sm:$0xff] }
 0x22a   : > { %v1145_v33 = vsub.f32 0.0, %v1136_v29  ;;  %v1728_v29 = vld [vmem:[#allocation16 + $0xf8] sm:$0xff] }
 0x22b   : > { %v1140_v34 = vmul.f32 1.442695, %v1139_v32  ;;  %v1152_v38 = vsub.f32 0.0, %v1138_v36  ;;  %v1721_v32 = vld [vmem:[#allocation16 + $0xc0] sm:$0xff]  ;;  %v1723_v36 = vld [vmem:[#allocation16 + $0xd0] sm:$0xff] }
 0x22c   : > { %v1146_v35 = vmul.f32 1.442695, %v1145_v33  ;;  %v3078_v33 = vpack.c.bf16 %v1726_v27, %v1722_v26  ;;  %v1755_v26 = vld [vmem:[#allocation16 + $0x1d0] sm:$0xff] }
 0x22d   : > { %3426 = vpow2.f32 %v1140_v34  ;;  %v1153_v40 = vmul.f32 1.442695, %v1152_v38  ;;  %v3110_v34 = vpack.c.bf16 %v1728_v29, %v1724_v28  ;;  %v1727_v38 = vld [vmem:[#allocation16 + $0xf0] sm:$0xff]  ;;  %v1633_v29 = vld [vmem:[#allocation15 + $0x8] sm:$0xff] }
 0x22e   : > { %3428 = vpow2.f32 %v1146_v35  ;;  %v1725_v35 = vld [vmem:[#allocation16 + $0xe0] sm:$0xff]  ;;  %v1759_v27 = vld [vmem:[#allocation16 + $0x1f0] sm:$0xff] }
 0x22f   : > { %3430 = vpow2.f32 %v1153_v40  ;;  %v3080_v39 = vpack.c.bf16 %v1725_v35, %v1721_v32  ;;  %v3112_v40 = vpack.c.bf16 %v1727_v38, %v1723_v36  ;;  %v3128_v28 = vpack.c.bf16 %v1759_v27, %v1755_v26  ;;  %v1636_v35 = vld [vmem:[#allocation15 + $0x20] sm:$0xff]  ;;  %v1666_v26 = vld [vmem:[#allocation15 + $0x110] sm:$0xff] }
 0x230   : > { %3432 = vtanh.f32 %v1137_v41  ;;  %v1730_v41 = vld [vmem:[#allocation16 + $0x108] sm:$0xff]  ;;  %v1670_v27 = vld [vmem:[#allocation15 + $0x130] sm:$0xff] }
 0x237   : > { %v3427_v42 = vpop.eup %3426 }
 0x238   : > { %v3429_v43 = vpop.eup %3428  ;;  %v1142_v44 = vadd.f32 1.0, %v3427_v42  ;;  %v1734_v42 = vld [vmem:[#allocation16 + $0x128] sm:$0xff] }
 0x239   : > { %v1148_v45 = vadd.f32 1.0, %v3429_v43  ;;  %v3431_v46 = vpop.eup %3430  ;;  %v3082_v43 = vpack.c.bf16 %v1734_v42, %v1730_v41  ;;  %v1696_v41 = vld [vmem:[#allocation6] sm:$0xff] }
 0x23a   : > { %3434 = vrcp.f32 %v1142_v44  ;;  %v3433_v47 = vpop.eup %3432  ;;  %v1155_v52 = vadd.f32 1.0, %v3431_v46  ;;  %v1732_v44 = vld [vmem:[#allocation16 + $0x118] sm:$0xff]  ;;  %v1729_v46 = vld [vmem:[#allocation16 + $0x100] sm:$0xff] }
 0x23b   : > { %3436 = vrcp.f32 %v1148_v45  ;;  %v1736_v45 = vld [vmem:[#allocation16 + $0x138] sm:$0xff] }
 0x23c   : > { %3438 = vrcp.f32 %v1155_v52 }
 0x244   : > { %v3435_v49 = vpop.eup %3434 }
 0x245   : > { %v3437_v50 = vpop.eup %3436  ;;  %v1160_v51 = vmul.f32 %v3435_v49, %v3433_v47  ;;  %v3114_v47 = vpack.c.bf16 %v1736_v45, %v1732_v44  ;;  %v1731_v49 = vld [vmem:[#allocation16 + $0x110] sm:$0xff]  ;;  %v1645_v44 = vld [vmem:[#allocation15 + $0x68] sm:$0xff]  ;;  %v1643_v45 = vld [vmem:[#allocation15 + $0x58] sm:$0xff] }
 0x246   : > { %v1159_v53 = vmul.f32 %v3437_v50, %v1158_v48  ;;  %v3439_v63 = vpop.eup %3438  ;;  %v1733_v48 = vld [vmem:[#allocation16 + $0x120] sm:$0xff]  ;;  %v1735_v50 = vld [vmem:[#allocation16 + $0x130] sm:$0xff] }
 0x247   : > { %v3116_v52 = vpack.c.bf16 %v1735_v50, %v1731_v49  ;;  %v1644_v49 = vld [vmem:[#allocation15 + $0x60] sm:$0xff] }
 0x248   : > { %v1161_v54 = vadd.f32 %v1160_v51, %v1159_v53  ;;  %v3084_v51 = vpack.c.bf16 %v1733_v48, %v1729_v46  ;;  %v1738_v53 = vld [vmem:[#allocation16 + $0x148] sm:$0xff]  ;;  %v1640_v48 = vld [vmem:[#allocation15 + $0x40] sm:$0xff] }
 0x24a   : > { %1164 = vst [vmem:[#allocation3] sm:$0xff] %v1161_v54  ;;  %3440 = vtanh.f32 %v1161_v54  ;;  %v1742_v54 = vld [vmem:[#allocation16 + $0x168] sm:$0xff] }
 0x24b   : > { %v3086_v56 = vpack.c.bf16 %v1742_v54, %v1738_v53  ;;  %v1646_v53 = vld [vmem:[#allocation15 + $0x70] sm:$0xff] }
 0x254   : > { %v3441_v0 = vpop.eup %3440 }
 0x255   : > { %v1163_v5 = vmul.f32 %v3441_v0, %v3439_v63  ;;  %v1743_v63 = vld [vmem:[#allocation16 + $0x170] sm:$0xff] }
 0x256   : > { %v3120_v0 = vpack.c.bf16 %v1743_v63, %v1739_v62  ;;  %v3170_v62 = vpack.c.bf16 %v1655_v59, %v1651_v57  ;;  %v1695_v59 = vld [vmem:[#allocation15 + $0x1f8] sm:$0xff] }
 0x257   : > { %1165 = vst [vmem:[#allocation2] sm:$0xff] %v1163_v5  ;;  %1502 = vmatmul.mubr.f32.vlgmr.msra.gmra.mrb[2].mxu0 %v1163_v5  ;;  %1573 = vmatmul.mubr.f32.vlgmr.msra.gmra.mrb[2].mxu1 %v1163_v5  ;;  %v1752_v5 = vld [vmem:[#allocation16 + $0x1b8] sm:$0xff] }
 0x258   : > { %3069 = vmatpush1.bf16.msra.mxu0 %v3068_v1  ;;  %3101 = vmatpush1.bf16.msra.mxu1 %v3100_v2  ;;  %v1746_v1 = vld [vmem:[#allocation16 + $0x188] sm:$0xff]  ;;  %v3122_v9 = vpack.c.bf16 %v1752_v5, %v1748_v3 }
 0x259   : > { %3071 = vmatprep.subr.bf16.mxu0 %v3070_v6  ;;  %3103 = vmatprep.subr.bf16.mxu1 %v3102_v7  ;;  %v1750_v2 = vld [vmem:[#allocation16 + $0x1a8] sm:$0xff]  ;;  %v1745_v6 = vld [vmem:[#allocation16 + $0x180] sm:$0xff] }
 0x25a   : > { %1825 = vmatprep.mubr.f32.mxu0 %v3768_v8  ;;  %1896 = vmatprep.mubr.f32.mxu1 %v3768_v8  ;;  %v3090_v4 = vpack.c.bf16 %v1750_v2, %v1746_v1  ;;  %v1749_v7 = vld [vmem:[#allocation16 + $0x1a0] sm:$0xff]  ;;  %v1654_v1 = vld [vmem:[#allocation15 + $0xb0] sm:$0xff]  ;;  %v1657_v3 = vld [vmem:[#allocation15 + $0xc8] sm:$0xff] }
 0x25b   : > { %v3092_v10 = vpack.c.bf16 %v1749_v7, %v1745_v6  ;;  %v1663_v6 = vld [vmem:[#allocation15 + $0xf8] sm:$0xff]  ;;  %v1656_v7 = vld [vmem:[#allocation15 + $0xc0] sm:$0xff] }
 0x25c   : > { %3073 = vmatpush1.bf16.msra.mxu0 %v3072_v15  ;;  %3105 = vmatpush1.bf16.msra.mxu1 %v3104_v16  ;;  %v1758_v15 = vld [vmem:[#allocation16 + $0x1e8] sm:$0xff]  ;;  %v1756_v16 = vld [vmem:[#allocation16 + $0x1d8] sm:$0xff] }
 0x25d   : > { %3075 = vmatprep.subr.bf16.mxu0 %v3074_v20  ;;  %3107 = vmatprep.subr.bf16.mxu1 %v3106_v22  ;;  %v3094_v17 = vpack.c.bf16 %v1758_v15, %v1754_v14  ;;  %v1753_v20 = vld [vmem:[#allocation16 + $0x1c0] sm:$0xff]  ;;  %v3126_v23 = vpack.c.bf16 %v1760_v18, %v1756_v16  ;;  %v1665_v15 = vld [vmem:[#allocation15 + $0x108] sm:$0xff]  ;;  %v1667_v18 = vld [vmem:[#allocation15 + $0x118] sm:$0xff] }
 0x25e   : > { %v1757_v22 = vld [vmem:[#allocation16 + $0x1e0] sm:$0xff]  ;;  %v1669_v16 = vld [vmem:[#allocation15 + $0x128] sm:$0xff] }
 0x25f   : > { %v3096_v25 = vpack.c.bf16 %v1757_v22, %v1753_v20  ;;  %v1671_v20 = vld [vmem:[#allocation15 + $0x138] sm:$0xff]  ;;  %v1664_v22 = vld [vmem:[#allocation15 + $0x100] sm:$0xff] }
 0x260   : > { %3077 = vmatpush1.bf16.msra.mxu0 %v3076_v30  ;;  %3109 = vmatpush1.bf16.msra.mxu1 %v3108_v31  ;;  %v1637_v30 = vld [vmem:[#allocation15 + $0x28] sm:$0xff]  ;;  %v1635_v31 = vld [vmem:[#allocation15 + $0x18] sm:$0xff] }
 0x261   : > { %3079 = vmatprep.subr.bf16.mxu0 %v3078_v33  ;;  %3111 = vmatprep.subr.bf16.mxu1 %v3110_v34  ;;  %v3130_v32 = vpack.c.bf16 %v1637_v30, %v1633_v29  ;;  %v1639_v33 = vld [vmem:[#allocation15 + $0x38] sm:$0xff]  ;;  %v1632_v34 = vld [vmem:[#allocation15] sm:$0xff]  ;;  %v3180_v29 = vpack.c.bf16 %v1670_v27, %v1666_v26  ;;  %v1673_v30 = vld [vmem:[#allocation15 + $0x148] sm:$0xff] }
 0x262   : > { %v3162_v36 = vpack.c.bf16 %v1639_v33, %v1635_v31  ;;  %v3132_v38 = vpack.c.bf16 %v1636_v35, %v1632_v34  ;;  %v1677_v31 = vld [vmem:[#allocation15 + $0x168] sm:$0xff]  ;;  %v1679_v34 = vld [vmem:[#allocation15 + $0x178] sm:$0xff]  ;;  %v1672_v35 = vld [vmem:[#allocation15 + $0x140] sm:$0xff] }
 0x263   : > { %v3150_v33 = vpack.c.bf16 %v1677_v31, %v1673_v30  ;;  %v1624_v31 = vld [vmem:[#allocation5] sm:$0xff] }
 0x264   : > { %3081 = vmatpush1.bf16.msra.mxu0 %v3080_v39  ;;  %3113 = vmatpush1.bf16.msra.mxu1 %v3112_v40  ;;  %v1634_v39 = vld [vmem:[#allocation15 + $0x10] sm:$0xff] }
 0x265   : > { %3083 = vmatprep.subr.bf16.mxu0 %v3082_v43  ;;  %3115 = vmatprep.subr.bf16.mxu1 %v3114_v47  ;;  %v1638_v40 = vld [vmem:[#allocation15 + $0x30] sm:$0xff]  ;;  %v1641_v43 = vld [vmem:[#allocation15 + $0x48] sm:$0xff]  ;;  %v1647_v47 = vld [vmem:[#allocation15 + $0x78] sm:$0xff] }
 0x266   : > { %v3164_v42 = vpack.c.bf16 %v1638_v40, %v1634_v39  ;;  %v3134_v46 = vpack.c.bf16 %v1645_v44, %v1641_v43  ;;  %v3166_v50 = vpack.c.bf16 %v1647_v47, %v1643_v45  ;;  %v1674_v40 = vld [vmem:[#allocation15 + $0x150] sm:$0xff]  ;;  %v1685_v44 = vld [vmem:[#allocation15 + $0x1a8] sm:$0xff]  ;;  %v1683_v45 = vld [vmem:[#allocation15 + $0x198] sm:$0xff] }
 0x268   : > { %3085 = vmatpush1.bf16.msra.mxu0 %v3084_v51  ;;  %3117 = vmatpush1.bf16.msra.mxu1 %v3116_v52  ;;  %v3136_v51 = vpack.c.bf16 %v1644_v49, %v1640_v48  ;;  %v1642_v52 = vld [vmem:[#allocation15 + $0x50] sm:$0xff]  ;;  %v1680_v49 = vld [vmem:[#allocation15 + $0x180] sm:$0xff] }
 0x269   : > { %3087 = vmatprep.subr.bf16.mxu0 %v3086_v56  ;;  %3119 = vmatprep.subr.bf16.mxu1 %v3118_v60  ;;  %v3168_v54 = vpack.c.bf16 %v1646_v53, %v1642_v52  ;;  %v1653_v56 = vld [vmem:[#allocation15 + $0xa8] sm:$0xff]  ;;  %v1648_v60 = vld [vmem:[#allocation15 + $0x80] sm:$0xff]  ;;  %v1686_v53 = vld [vmem:[#allocation15 + $0x1b0] sm:$0xff] }
 0x26a   : > { %v3138_v58 = vpack.c.bf16 %v1653_v56, %v1649_v55  ;;  %v1693_v55 = vld [vmem:[#allocation15 + $0x1e8] sm:$0xff] }
 0x26c   : > { %3089 = vmatpush1.bf16.msra.mxu0 %v3088_v61  ;;  %3121 = vmatpush1.bf16.msra.mxu1 %v3120_v0  ;;  %v1652_v61 = vld [vmem:[#allocation15 + $0xa0] sm:$0xff]  ;;  %v1650_v0 = vld [vmem:[#allocation15 + $0x90] sm:$0xff] }
 0x26d   : > { %3091 = vmatprep.subr.bf16.mxu0 %v3090_v4  ;;  %3123 = vmatprep.subr.bf16.mxu1 %v3122_v9  ;;  %v3140_v63 = vpack.c.bf16 %v1652_v61, %v1648_v60  ;;  %v3172_v2 = vpack.c.bf16 %v1654_v1, %v1650_v0  ;;  %v1661_v4 = vld [vmem:[#allocation15 + $0xe8] sm:$0xff]  ;;  %v1660_v9 = vld [vmem:[#allocation15 + $0xe0] sm:$0xff]  ;;  %v1694_v0 = vld [vmem:[#allocation15 + $0x1f0] sm:$0xff] }
 0x26e   : > { %v3142_v5 = vpack.c.bf16 %v1661_v4, %v1657_v3  ;;  %v3144_v11 = vpack.c.bf16 %v1660_v9, %v1656_v7  ;;  %v1688_v60 = vld [vmem:[#allocation15 + $0x1c0] sm:$0xff]  ;;  %v1579_v3 = vld [vmem:[%s4347_s6] sm:$0xf] }
 0x26f   : > { %v1584_v4 = vrot.slane %v1579_v3, %v4168_v19 }
 0x270   : > { %3093 = vmatpush1.bf16.msra.mxu0 %v3092_v10  ;;  %3125 = vmatpush1.bf16.msra.mxu1 %v3124_v13  ;;  %v1662_v13 = vld [vmem:[#allocation15 + $0xf0] sm:$0xff] }
 0x271   : > { %3095 = vmatprep.subr.bf16.mxu0 %v3094_v17  ;;  %3127 = vmatprep.subr.bf16.mxu1 %v3126_v23  ;;  %v3176_v14 = vpack.c.bf16 %v1662_v13, %v1658_v12  ;;  %v3146_v17 = vpack.c.bf16 %v1669_v16, %v1665_v15  ;;  %v3178_v23 = vpack.c.bf16 %v1671_v20, %v1667_v18 }
 0x272   : > { %v1596_v12 = vrot.slane %v1579_v3, %v4177_v24  ;;  %v1592_v20 = vrot.slane %v1579_v3, %v4180_v37 }
 0x274   : > { %3097 = vmatpush1.bf16.msra.mxu0 %v3096_v25  ;;  %3129 = vmatpush1.bf16.msra.mxu1 %v3128_v28  ;;  %v1668_v25 = vld [vmem:[#allocation15 + $0x120] sm:$0xff] }
 0x275   : > { %3131 = vmatprep.subr.bf16.mxu0 %v3130_v32  ;;  %3163 = vmatprep.subr.bf16.mxu1 %v3162_v36  ;;  %v3148_v28 = vpack.c.bf16 %v1668_v25, %v1664_v22  ;;  %v1675_v32 = vld [vmem:[#allocation15 + $0x158] sm:$0xff]  ;;  %v1676_v36 = vld [vmem:[#allocation15 + $0x160] sm:$0xff] }
 0x276   : > { %v3152_v39 = vpack.c.bf16 %v1676_v36, %v1672_v35 }
 0x277   : > { %1826 = vmatmul.mubr.f32.vlgmr.msra.gmra.mrb[4].mxu0 %v1696_v41  ;;  %1897 = vmatmul.mubr.f32.vlgmr.msra.gmra.mrb[4].mxu1 %v1696_v41  ;;  %v1678_v41 = vld [vmem:[#allocation15 + $0x170] sm:$0xff] }
 0x278   : > { %3133 = vmatpush1.bf16.msra.mxu0 %v3132_v38  ;;  %3165 = vmatpush1.bf16.msra.mxu1 %v3164_v42  ;;  %v3182_v38 = vpack.c.bf16 %v1679_v34, %v1675_v32  ;;  %v1681_v42 = vld [vmem:[#allocation15 + $0x188] sm:$0xff]  ;;  %v3184_v43 = vpack.c.bf16 %v1678_v41, %v1674_v40 }
 0x279   : > { %1967 = vmatprep.mubr.f32.mxu0 %v3768_v8  ;;  %3135 = vmatprep.subr.bf16.mxu0 %v3134_v46  ;;  %v1687_v46 = vld [vmem:[#allocation15 + $0x1b8] sm:$0xff]  ;;  %v3154_v47 = vpack.c.bf16 %v1685_v44, %v1681_v42  ;;  %v2045_v42 = vld [vmem:[%s4350_s9] sm:$0xf] }
 0x27a   : > { %2038 = vmatprep.mubr.f32.mxu1 %v3768_v8  ;;  %3167 = vmatprep.subr.bf16.mxu1 %v3166_v50  ;;  %v1659_v8 = vld [vmem:[#allocation15 + $0xd8] sm:$0xff]  ;;  %v3186_v48 = vpack.c.bf16 %v1687_v46, %v1683_v45  ;;  %v1684_v50 = vld [vmem:[#allocation15 + $0x1a0] sm:$0xff]  ;;  %v2054_v44 = vrot.slane %v2045_v42, %v4173_v21 }
 0x27b   : > { %v3174_v10 = vpack.c.bf16 %v1663_v6, %v1659_v8  ;;  %v3156_v52 = vpack.c.bf16 %v1684_v50, %v1680_v49  ;;  %v1588_v8 = vrot.slane %v1579_v3, %v4173_v21 }
 0x27c   : > { %3137 = vmatpush1.bf16.msra.mxu0 %v3136_v51  ;;  %3169 = vmatpush1.bf16.msra.mxu1 %v3168_v54  ;;  %v1682_v51 = vld [vmem:[#allocation15 + $0x190] sm:$0xff]  ;;  %v1689_v54 = vld [vmem:[#allocation15 + $0x1c8] sm:$0xff] }
 0x27d   : > { %3139 = vmatprep.subr.bf16.mxu0 %v3138_v58  ;;  %3171 = vmatprep.subr.bf16.mxu1 %v3170_v62  ;;  %v3188_v56 = vpack.c.bf16 %v1686_v53, %v1682_v51  ;;  %v3158_v57 = vpack.c.bf16 %v1693_v55, %v1689_v54  ;;  %v1691_v58 = vld [vmem:[#allocation15 + $0x1d8] sm:$0xff]  ;;  %v1692_v62 = vld [vmem:[#allocation15 + $0x1e0] sm:$0xff]  ;;  %v2062_v51 = vrot.slane %v2045_v42, %v4177_v24 }
 0x27e   : > { %v3190_v61 = vpack.c.bf16 %v1695_v59, %v1691_v58  ;;  %v3160_v1 = vpack.c.bf16 %v1692_v62, %v1688_v60  ;;  %v2058_v58 = vrot.slane %v2045_v42, %v4180_v37 }
 0x280   : > { %3141 = vmatpush1.bf16.msra.mxu0 %v3140_v63  ;;  %3173 = vmatpush1.bf16.msra.mxu1 %v3172_v2  ;;  %v1690_v63 = vld [vmem:[#allocation15 + $0x1d0] sm:$0xff] }
 0x281   : > { %3143 = vmatprep.subr.bf16.mxu0 %v3142_v5  ;;  %3175 = vmatprep.subr.bf16.mxu1 %v3174_v10  ;;  %v3192_v2 = vpack.c.bf16 %v1694_v0, %v1690_v63 }
 0x284   : > { %3145 = vmatpush1.bf16.msra.mxu0 %v3144_v11  ;;  %3177 = vmatpush1.bf16.msra.mxu1 %v3176_v14 }
 0x285   : > { %3147 = vmatprep.subr.bf16.mxu0 %v3146_v17  ;;  %3179 = vmatprep.subr.bf16.mxu1 %v3178_v23 }
 0x288   : > { %3149 = vmatpush1.bf16.msra.mxu0 %v3148_v28  ;;  %3181 = vmatpush1.bf16.msra.mxu1 %v3180_v29 }
 0x289   : > { %3151 = vmatprep.subr.bf16.mxu0 %v3150_v33  ;;  %3183 = vmatprep.subr.bf16.mxu1 %v3182_v38 }
 0x28c   : > { %3153 = vmatpush1.bf16.msra.mxu0 %v3152_v39  ;;  %3185 = vmatpush1.bf16.msra.mxu1 %v3184_v43  ;;  %v2050_v43 = vrot.slane %v2045_v42, %v4168_v19  ;;  %v2118_v42 = vld [vmem:[%s4351_s10 + $0x80] sm:$0xff] (!%p2665_p12) }
 0x28d   : > { %3155 = vmatprep.subr.bf16.mxu0 %v3154_v47  ;;  %3187 = vmatprep.subr.bf16.mxu1 %v3186_v48 }
 0x290   : > { %3157 = vmatpush1.bf16.msra.mxu0 %v3156_v52  ;;  %3189 = vmatpush1.bf16.msra.mxu1 %v3188_v56 }
 0x291   : > { %3159 = vmatprep.subr.bf16.mxu0 %v3158_v57  ;;  %3191 = vmatprep.subr.bf16.mxu1 %v3190_v61 }
 0x294   : > { %3161 = vmatpush1.bf16.msra.mxu0 %v3160_v1  ;;  %3193 = vmatpush1.bf16.msra.mxu1 %v3192_v2  ;;  %v2090_v2 = vld [vmem:[#allocation7] sm:$0xff] }
 0x32a   : > { %v1503_v5 = vpop.f32.mrb[2].mxu0  ;;  %v1574_v6 = vpop.f32.mrb[2].mxu1 }
 0x32b   : > { %v1601_v7 = vadd.f32 %v1584_v4, %v1503_v5  ;;  %v1505_v9 = vpop.f32.mrb[3].mxu0  ;;  %v1576_v10 = vpop.f32.mrb[3].mxu1  ;;  %v1603_v23 = vadd.f32 %v1592_v20, %v1574_v6 }
 0x32c   : > { %v1602_v11 = vadd.f32 %v1588_v8, %v1505_v9  ;;  %v1604_v17 = vadd.f32 %v1596_v12, %v1576_v10  ;;  %v2105_v12 = vld [vmem:[%s4351_s10 + $0x18] sm:$0xff] (!%p2665_p12) }
 0x32d   : > { %v1605_v13 = vsub.f32 0.0, %v1601_v7 }
 0x32e   : > { %v1611_v14 = vsub.f32 0.0, %v1602_v11  ;;  %v1618_v18 = vsub.f32 0.0, %v1604_v17  ;;  %v2103_v11 = vld [vmem:[%s4351_s10 + $0x8] sm:$0xff] (!%p2665_p12)  ;;  %v2109_v17 = vld [vmem:[%s4351_s10 + $0x38] sm:$0xff] (!%p2665_p12) }
 0x32f   : > { %v1606_v15 = vmul.f32 1.442695, %v1605_v13  ;;  %v2102_v13 = vld [vmem:[%s4351_s10] sm:$0xff] (!%p2665_p12) }
 0x330   : > { %v1612_v16 = vmul.f32 1.442695, %v1611_v14  ;;  %v1619_v22 = vmul.f32 1.442695, %v1618_v18  ;;  %v3194_v14 = vpack.c.bf16 (!%p2665_p12), %v2105_v12, %v2103_v11  ;;  %v3769_v18 = vmov (!%p2665_p12), 0.0   ;;  %v2229_v11 = vld [vmem:[#allocation18 + $0x30] sm:$0xff] (!%p2665_p12) }
 0x331   : > { %3442 = vpow2.f32 %v1606_v15  ;;  %v2104_v15 = vld [vmem:[%s4351_s10 + $0x10] sm:$0xff] (!%p2665_p12)  ;;  %v2230_v12 = vld [vmem:[#allocation18 + $0x38] sm:$0xff] (!%p2665_p12) }
 0x332   : > { %3444 = vpow2.f32 %v1612_v16  ;;  %v2107_v16 = vld [vmem:[%s4351_s10 + $0x28] sm:$0xff] (!%p2665_p12)  ;;  %v3196_v20 = vpack.c.bf16 (!%p2665_p12), %v2104_v15, %v2102_v13  ;;  %3195 = vmatprep.subr.bf16.mxu0 (!%p2665_p12), %v3194_v14  ;;  %v2128_v14 = vld [vmem:[%s4351_s10 + $0xd0] sm:$0xff] (!%p2665_p12) }
 0x333   : > { %3446 = vpow2.f32 %v1619_v22  ;;  %v3198_v22 = vpack.c.bf16 (!%p2665_p12), %v2109_v17, %v2107_v16  ;;  %v2247_v15 = vld [vmem:[#allocation18 + $0xc0] sm:$0xff] (!%p2665_p12)  ;;  %v2248_v16 = vld [vmem:[#allocation18 + $0xc8] sm:$0xff] (!%p2665_p12)  ;;  %v2131_v17 = vld [vmem:[%s4351_s10 + $0xe8] sm:$0xff] (!%p2665_p12) }
 0x334   : > { %3448 = vtanh.f32 %v1603_v23  ;;  %v2106_v23 = vld [vmem:[%s4351_s10 + $0x20] sm:$0xff] (!%p2665_p12) }
 0x33b   : > { %v3443_v25 = vpop.eup %3442 }
 0x33c   : > { %v3445_v26 = vpop.eup %3444  ;;  %v1608_v27 = vadd.f32 1.0, %v3443_v25  ;;  %v2108_v25 = vld [vmem:[%s4351_s10 + $0x30] sm:$0xff] (!%p2665_p12) }
 0x33d   : > { %v1614_v28 = vadd.f32 1.0, %v3445_v26  ;;  %v3447_v29 = vpop.eup %3446  ;;  %v2111_v26 = vld [vmem:[%s4351_s10 + $0x48] sm:$0xff] (!%p2665_p12) }
 0x33e   : > { %3450 = vrcp.f32 %v1608_v27  ;;  %v3449_v30 = vpop.eup %3448  ;;  %v1621_v35 = vadd.f32 1.0, %v3447_v29  ;;  %v2113_v27 = vld [vmem:[%s4351_s10 + $0x58] sm:$0xff] (!%p2665_p12) }
 0x33f   : > { %3452 = vrcp.f32 %v1614_v28  ;;  %v3200_v28 = vpack.c.bf16 (!%p2665_p12), %v2108_v25, %v2106_v23  ;;  %v3202_v29 = vpack.c.bf16 (!%p2665_p12), %v2113_v27, %v2111_v26  ;;  %v2130_v25 = vld [vmem:[%s4351_s10 + $0xe0] sm:$0xff] (!%p2665_p12)  ;;  %v3242_v26 = vpack.c.bf16 (!%p2665_p12), %v2248_v16, %v2247_v15  ;;  %v2231_v27 = vld [vmem:[#allocation18 + $0x40] sm:$0xff] (!%p2665_p12) }
 0x340   : > { %3454 = vrcp.f32 %v1621_v35  ;;  %v2347_v16 = vld [vmem:[#allocation19 + $0x60] sm:$0xff] (!%p2665_p12) }
 0x348   : > { %v3451_v32 = vpop.eup %3450 }
 0x349   : > { %v3453_v33 = vpop.eup %3452  ;;  %v1626_v34 = vmul.f32 %v3451_v32, %v3449_v30  ;;  %v2110_v30 = vld [vmem:[%s4351_s10 + $0x40] sm:$0xff] (!%p2665_p12)  ;;  %v2115_v32 = vld [vmem:[%s4351_s10 + $0x68] sm:$0xff] (!%p2665_p12) }
 0x34a   : > { %v1625_v36 = vmul.f32 %v3453_v33, %v1624_v31  ;;  %v3455_v39 = vpop.eup %3454  ;;  %v2112_v31 = vld [vmem:[%s4351_s10 + $0x50] sm:$0xff] (!%p2665_p12)  ;;  %v2117_v33 = vld [vmem:[%s4351_s10 + $0x78] sm:$0xff] (!%p2665_p12) }
 0x34b   : > { %v3206_v35 = vpack.c.bf16 (!%p2665_p12), %v2117_v33, %v2115_v32  ;;  %v2250_v32 = vld [vmem:[#allocation18 + $0xd8] sm:$0xff] (!%p2665_p12) }
 0x34c   : > { %v1627_v38 = vadd.f32 %v1626_v34, %v1625_v36  ;;  %v3204_v34 = vpack.c.bf16 (!%p2665_p12), %v2112_v31, %v2110_v30  ;;  %v2114_v36 = vld [vmem:[%s4351_s10 + $0x60] sm:$0xff] (!%p2665_p12)  ;;  %v2132_v30 = vld [vmem:[%s4351_s10 + $0xf0] sm:$0xff] (!%p2665_p12) }
 0x34d   : > { %v2249_v31 = vld [vmem:[#allocation18 + $0xd0] sm:$0xff] (!%p2665_p12) }
 0x34e   : > { %1630 = vst [vmem:[#allocation5] sm:$0xff] %v1627_v38  ;;  %3456 = vtanh.f32 %v1627_v38  ;;  %v2116_v38 = vld [vmem:[%s4351_s10 + $0x70] sm:$0xff] (!%p2665_p12) }
 0x358   : > { %v3457_v40 = vpop.eup %3456 }
 0x359   : > { %v1629_v41 = vmul.f32 %v3457_v40, %v3455_v39  ;;  %v2119_v39 = vld [vmem:[%s4351_s10 + $0x88] sm:$0xff] (!%p2665_p12)  ;;  %v2121_v40 = vld [vmem:[%s4351_s10 + $0x98] sm:$0xff] (!%p2665_p12) }
 0x35b   : > { %1631 = vst [vmem:[#allocation4] sm:$0xff] %v1629_v41  ;;  %1968 = vmatmul.mubr.f32.vlgmr.msra.gmra.mrb[4].mxu0 %v1629_v41  ;;  %2039 = vmatmul.mubr.f32.vlgmr.msra.gmra.mrb[4].mxu1 %v1629_v41  ;;  %v2239_v41 = vld [vmem:[#allocation18 + $0x80] sm:$0xff] (!%p2665_p12) }
 0x35c   : > { %2210 = vmatprep.mubr.f32.mxu0 (!%p2665_p12), %v3769_v18  ;;  %3197 = vmatpush1.bf16.msra.mxu0 (!%p2665_p12), %v3196_v20  ;;  %v2133_v20 = vld [vmem:[%s4351_s10 + $0xf8] sm:$0xff] (!%p2665_p12) }
 0x35d   : > { %3199 = vmatprep.subr.bf16.mxu0 (!%p2665_p12), %v3198_v22  ;;  %v3240_v22 = vpack.c.bf16 (!%p2665_p12), %v2230_v12, %v2229_v11 }
 0x360   : > { %3201 = vmatpush1.bf16.msra.mxu0 (!%p2665_p12), %v3200_v28  ;;  %v2232_v28 = vld [vmem:[#allocation18 + $0x48] sm:$0xff] (!%p2665_p12) }
 0x361   : > { %3203 = vmatprep.subr.bf16.mxu0 (!%p2665_p12), %v3202_v29  ;;  %v3222_v29 = vpack.c.bf16 (!%p2665_p12), %v2133_v20, %v2131_v17  ;;  %v3244_v33 = vpack.c.bf16 (!%p2665_p12), %v2232_v28, %v2231_v27  ;;  %v2348_v17 = vld [vmem:[#allocation19 + $0x68] sm:$0xff] (!%p2665_p12)  ;;  %v2434_v28 = vld [vmem:[#allocation21 + $0x18] sm:$0xff] (!%p2665_p12) }
 0x362   : > { %v3277_v20 = vpack.c.bf16 (!%p2665_p12), %v2348_v17, %v2347_v16 }
 0x364   : > { %3205 = vmatpush1.bf16.msra.mxu0 (!%p2665_p12), %v3204_v34  ;;  %v3224_v34 = vpack.c.bf16 (!%p2665_p12), %v2132_v30, %v2130_v25  ;;  %v2432_v25 = vld [vmem:[#allocation21 + $0x8] sm:$0xff] (!%p2665_p12)  ;;  %v2435_v30 = vld [vmem:[#allocation21 + $0x20] sm:$0xff] (!%p2665_p12) }
 0x365   : > { %3207 = vmatprep.subr.bf16.mxu0 (!%p2665_p12), %v3206_v35  ;;  %v3246_v35 = vpack.c.bf16 (!%p2665_p12), %v2250_v32, %v2249_v31  ;;  %v2436_v31 = vld [vmem:[#allocation21 + $0x28] sm:$0xff] (!%p2665_p12) }
 0x366   : > { %v3289_v32 = vpack.c.bf16 (!%p2665_p12), %v2436_v31, %v2435_v30 }
 0x42e   : > { %v1969_v45 = vpop.f32.mrb[4].mxu0  ;;  %v2040_v46 = vpop.f32.mrb[4].mxu1 }
 0x42f   : > { %v2067_v47 = vadd.f32 %v2050_v43, %v1969_v45  ;;  %v1971_v48 = vpop.f32.mrb[5].mxu0  ;;  %v2042_v49 = vpop.f32.mrb[5].mxu1  ;;  %v2069_v60 = vadd.f32 %v2058_v58, %v2040_v46  ;;  %v2120_v43 = vld [vmem:[%s4351_s10 + $0x90] sm:$0xff] (!%p2665_p12)  ;;  %v2224_v46 = vld [vmem:[#allocation18 + $0x8] sm:$0xff] (!%p2665_p12)  ;;  %v2123_v58 = vld [vmem:[%s4351_s10 + $0xa8] sm:$0xff] (!%p2665_p12) }
 0x430   : > { %v2068_v50 = vadd.f32 %v2054_v44, %v1971_v48  ;;  %v2070_v56 = vadd.f32 %v2062_v51, %v2042_v49  ;;  %v2240_v44 = vld [vmem:[#allocation18 + $0x88] sm:$0xff] (!%p2665_p12)  ;;  %v2223_v45 = vld [vmem:[#allocation18] sm:$0xff] (!%p2665_p12)  ;;  %v2242_v51 = vld [vmem:[#allocation18 + $0x98] sm:$0xff] (!%p2665_p12) }
 0x431   : > { %v2071_v52 = vsub.f32 0.0, %v2067_v47  ;;  %v3208_v47 = vpack.c.bf16 (!%p2665_p12), %v2116_v38, %v2114_v36  ;;  %v3226_v48 = vpack.c.bf16 (!%p2665_p12), %v2240_v44, %v2239_v41  ;;  %v3228_v49 = vpack.c.bf16 (!%p2665_p12), %v2224_v46, %v2223_v45  ;;  %v2233_v36 = vld [vmem:[#allocation18 + $0x50] sm:$0xff] (!%p2665_p12)  ;;  %v2234_v38 = vld [vmem:[#allocation18 + $0x58] sm:$0xff] (!%p2665_p12)  ;;  %v2252_v41 = vld [vmem:[#allocation18 + $0xe8] sm:$0xff] (!%p2665_p12) }
 0x432   : > { %v2077_v53 = vsub.f32 0.0, %v2068_v50  ;;  %v2084_v57 = vsub.f32 0.0, %v2070_v56  ;;  %v2241_v50 = vld [vmem:[#allocation18 + $0x90] sm:$0xff] (!%p2665_p12)  ;;  %v2243_v56 = vld [vmem:[#allocation18 + $0xa0] sm:$0xff] (!%p2665_p12)  ;;  %v2236_v44 = vld [vmem:[#allocation18 + $0x68] sm:$0xff] (!%p2665_p12) }
 0x433   : > { %v2072_v54 = vmul.f32 1.442695, %v2071_v52  ;;  %v2225_v52 = vld [vmem:[#allocation18 + $0x10] sm:$0xff] (!%p2665_p12)  ;;  %3227 = vmatprep.subr.bf16.mxu1 (!%p2665_p12), %v3226_v48  ;;  %3209 = vmatpush1.bf16.msra.mxu0 (!%p2665_p12), %v3208_v47  ;;  %v2254_v47 = vld [vmem:[#allocation18 + $0xf8] sm:$0xff] (!%p2665_p12) }
 0x434   : > { %v2078_v55 = vmul.f32 1.442695, %v2077_v53  ;;  %v2085_v59 = vmul.f32 1.442695, %v2084_v57  ;;  %v3210_v53 = vpack.c.bf16 (!%p2665_p12), %v2121_v40, %v2119_v39  ;;  %v2244_v57 = vld [vmem:[#allocation18 + $0xa8] sm:$0xff] (!%p2665_p12)  ;;  %3229 = vmatpush3.bf16.msra.mxu1 (!%p2665_p12), %v3228_v49  ;;  %v3248_v39 = vpack.c.bf16 (!%p2665_p12), %v2234_v38, %v2233_v36  ;;  %v2251_v40 = vld [vmem:[#allocation18 + $0xe0] sm:$0xff] (!%p2665_p12) }
 0x435   : > { %3458 = vpow2.f32 %v2072_v54  ;;  %v3230_v54 = vpack.c.bf16 (!%p2665_p12), %v2242_v51, %v2241_v50  ;;  %v2253_v46 = vld [vmem:[#allocation18 + $0xf0] sm:$0xff] (!%p2665_p12)  ;;  %v2238_v50 = vld [vmem:[#allocation18 + $0x78] sm:$0xff] (!%p2665_p12)  ;;  %v2440_v36 = vld [vmem:[#allocation21 + $0x48] sm:$0xff] (!%p2665_p12) }
 0x436   : > { %3460 = vpow2.f32 %v2078_v55  ;;  %v2226_v55 = vld [vmem:[#allocation18 + $0x18] sm:$0xff] (!%p2665_p12)  ;;  %3211 = vmatprep.subr.bf16.mxu0 (!%p2665_p12), %v3210_v53  ;;  %v3254_v48 = vpack.c.bf16 (!%p2665_p12), %v2254_v47, %v2253_v46  ;;  %v2237_v49 = vld [vmem:[#allocation18 + $0x70] sm:$0xff] (!%p2665_p12)  ;;  %v2336_v53 = vld [vmem:[#allocation19 + $0x8] sm:$0xff] (!%p2665_p12) }
 0x437   : > { %3462 = vpow2.f32 %v2085_v59  ;;  %v2125_v59 = vld [vmem:[%s4351_s10 + $0xb8] sm:$0xff] (!%p2665_p12)  ;;  %3231 = vmatprep.subr.bf16.mxu1 (!%p2665_p12), %v3230_v54  ;;  %v3256_v51 = vpack.c.bf16 (!%p2665_p12), %v2238_v50, %v2237_v49  ;;  %v3770_v54 = vmov (!%p2665_p12), 0.0|0.0   ;;  %v2666_v46 = vld [vmem:[%s4405_s17] ss:$0 sm:$0xff] (!%p2665_p12) }
 0x438   : > { %3464 = vtanh.f32 %v2069_v60  ;;  %v3232_v60 = vpack.c.bf16 (!%p2665_p12), %v2226_v55, %v2225_v52  ;;  %v2335_v52 = vld [vmem:[#allocation19] sm:$0xff] (!%p2665_p12) }
 0x439   : > { %v3259_v55 = vpack.c.bf16 (!%p2665_p12), %v2336_v53, %v2335_v52  ;;  %v2445_v52 = vld [vmem:[#allocation21 + $0x70] sm:$0xff] (!%p2665_p12)  ;;  %v2446_v53 = vld [vmem:[#allocation21 + $0x78] sm:$0xff] (!%p2665_p12) }
 0x43a   : > { %3233 = vmatpush3.bf16.msra.mxu1 (!%p2665_p12), %v3232_v60 }
 0x43f   : > { %v3459_v61 = vpop.eup %3458 }
 0x440   : > { %v3461_v62 = vpop.eup %3460  ;;  %v2074_v63 = vadd.f32 1.0, %v3459_v61  ;;  %v3212_v61 = vpack.c.bf16 (!%p2665_p12), %v2120_v43, %v2118_v42  ;;  %v3250_v42 = vpack.c.bf16 (!%p2665_p12), %v2252_v41, %v2251_v40  ;;  %v2235_v43 = vld [vmem:[#allocation18 + $0x60] sm:$0xff] (!%p2665_p12)  ;;  %v2442_v40 = vld [vmem:[#allocation21 + $0x58] sm:$0xff] (!%p2665_p12) }
 0x441   : > { %v2080_v0 = vadd.f32 1.0, %v3461_v62  ;;  %v3463_v24 = vpop.eup %3462  ;;  %v2122_v62 = vld [vmem:[%s4351_s10 + $0xa0] sm:$0xff] (!%p2665_p12)  ;;  %v3252_v45 = vpack.c.bf16 (!%p2665_p12), %v2236_v44, %v2235_v43  ;;  %v2444_v43 = vld [vmem:[#allocation21 + $0x68] sm:$0xff] (!%p2665_p12) }
 0x442   : > { %3466 = vrcp.f32 %v2074_v63  ;;  %v3465_v1 = vpop.eup %3464  ;;  %v2087_v5 = vadd.f32 1.0, %v3463_v24  ;;  %v3234_v63 = vpack.c.bf16 (!%p2665_p12), %v2244_v57, %v2243_v56  ;;  %v2228_v24 = vld [vmem:[#allocation18 + $0x28] sm:$0xff] (!%p2665_p12)  ;;  %3213 = vmatpush1.bf16.msra.mxu0 (!%p2665_p12), %v3212_v61  ;;  %v2338_v56 = vld [vmem:[#allocation19 + $0x18] sm:$0xff] (!%p2665_p12)  ;;  %v2341_v61 = vld [vmem:[#allocation19 + $0x30] sm:$0xff] (!%p2665_p12) }
 0x443   : > { %3468 = vrcp.f32 %v2080_v0  ;;  %v2227_v0 = vld [vmem:[#allocation18 + $0x20] sm:$0xff] (!%p2665_p12) }
 0x444   : > { %3470 = vrcp.f32 %v2087_v5  ;;  %v2129_v5 = vld [vmem:[%s4351_s10 + $0xd8] sm:$0xff] (!%p2665_p12)  ;;  %3235 = vmatprep.subr.bf16.mxu1 (!%p2665_p12), %v3234_v63 }
 0x44c   : > { %v3467_v3 = vpop.eup %3466 }
 0x44d   : > { %v3469_v4 = vpop.eup %3468  ;;  %v2092_v8 = vmul.f32 %v3467_v3, %v3465_v1  ;;  %v3214_v1 = vpack.c.bf16 (!%p2665_p12), %v2125_v59, %v2123_v58  ;;  %v2245_v3 = vld [vmem:[#allocation18 + $0xb0] sm:$0xff] (!%p2665_p12)  ;;  %v2339_v58 = vld [vmem:[#allocation19 + $0x20] sm:$0xff] (!%p2665_p12)  ;;  %v2340_v59 = vld [vmem:[#allocation19 + $0x28] sm:$0xff] (!%p2665_p12) }
 0x44e   : > { %v2091_v6 = vmul.f32 %v3469_v4, %v2090_v2  ;;  %v3471_v37 = vpop.eup %3470  ;;  %v2124_v2 = vld [vmem:[%s4351_s10 + $0xb0] sm:$0xff] (!%p2665_p12)  ;;  %v2246_v4 = vld [vmem:[#allocation18 + $0xb8] sm:$0xff] (!%p2665_p12)  ;;  %v3265_v60 = vpack.c.bf16 (!%p2665_p12), %v2340_v59, %v2339_v58 }
 0x44f   : > { %3215 = vmatprep.subr.bf16.mxu0 (!%p2665_p12), %v3214_v1 }
 0x450   : > { %v2093_v7 = vadd.f32 %v2092_v8, %v2091_v6  ;;  %v2127_v8 = vld [vmem:[%s4351_s10 + $0xc8] sm:$0xff] (!%p2665_p12)  ;;  %v3236_v6 = vpack.c.bf16 (!%p2665_p12), %v2228_v24, %v2227_v0  ;;  %v2343_v0 = vld [vmem:[#allocation19 + $0x40] sm:$0xff] (!%p2665_p12)  ;;  %v2344_v24 = vld [vmem:[#allocation19 + $0x48] sm:$0xff] (!%p2665_p12) }
 0x451   : > { %v3218_v13 = vpack.c.bf16 (!%p2665_p12), %v2129_v5, %v2127_v8  ;;  %v3271_v1 = vpack.c.bf16 (!%p2665_p12), %v2344_v24, %v2343_v0  ;;  %v2134_v8 = vld [vmem:[%s4352_s11] sm:$0x3] (!%p2665_p12) }
 0x452   : > { %3472 = vtanh.f32 %v2093_v7  ;;  %2096 = vst [vmem:[#allocation7] sm:$0xff] %v2093_v7  ;;  %v3216_v7 = vpack.c.bf16 (!%p2665_p12), %v2124_v2, %v2122_v62  ;;  %3237 = vmatpush3.bf16.msra.mxu1 (!%p2665_p12), %v3236_v6  ;;  %v2342_v62 = vld [vmem:[#allocation19 + $0x38] sm:$0xff] (!%p2665_p12)  ;;  %v2345_v2 = vld [vmem:[#allocation19 + $0x50] sm:$0xff] (!%p2665_p12)  ;;  %v2139_v5 = vrot.slane (!%p2665_p12), %v2134_v8, %v4168_v19  ;;  %v2143_v6 = vrot.slane (!%p2665_p12), %v2134_v8, %v4173_v21 }
 0x453   : > { %v3268_v63 = vpack.c.bf16 (!%p2665_p12), %v2342_v62, %v2341_v61  ;;  %v2349_v19 = vld [vmem:[#allocation19 + $0x70] sm:$0xff] (!%p2665_p12)  ;;  %v2350_v21 = vld [vmem:[#allocation19 + $0x78] sm:$0xff] (!%p2665_p12) }
 0x454   : > { %3217 = vmatpush1.bf16.msra.mxu0 (!%p2665_p12), %v3216_v7 }
 0x455   : > { %3219 = vmatprep.subr.bf16.mxu0 (!%p2665_p12), %v3218_v13 }
 0x459   : > { %2101 = sbr.rel (%p2665_p12) target bundleno = 1998 (0x7ce), region = 136 }
 0x45c   : > { %v3473_v9 = vpop.eup %3472 }
 0x45d   : > { %v4201_v10 = vmul.f32 %v3473_v9, %v3471_v37  ;;  %v2126_v37 = vld [vmem:[%s4351_s10 + $0xc0] sm:$0xff] (!%p2665_p12)  ;;  %v3238_v9 = vpack.c.bf16 (!%p2665_p12), %v2246_v4, %v2245_v3  ;;  %v2346_v3 = vld [vmem:[#allocation19 + $0x58] sm:$0xff] (!%p2665_p12) }
 0x45e   : > { %v3220_v23 = vpack.c.bf16 (!%p2665_p12), %v2128_v14, %v2126_v37  ;;  %v3274_v4 = vpack.c.bf16 (!%p2665_p12), %v2346_v3, %v2345_v2 }
 0x45f   : > { %2097 = vst [vmem:[#allocation6] sm:$0xff] %v4201_v10  ;;  %3239 = vmatprep.subr.bf16.mxu1 (!%p2665_p12), %v3238_v9 }
 0x460   : > { %3241 = vmatpush3.bf16.msra.mxu1 %v3240_v22  ;;  %3221 = vmatpush1.bf16.msra.mxu0 %v3220_v23  ;;  %v3280_v22 = vpack.c.bf16 %v2350_v21, %v2349_v19  ;;  %v2431_v23 = vld [vmem:[#allocation21] sm:$0xff] }
 0x461   : > { %3243 = vmatprep.subr.bf16.mxu1 %v3242_v26  ;;  %3223 = vmatprep.subr.bf16.mxu0 %v3222_v29  ;;  %v2433_v26 = vld [vmem:[#allocation21 + $0x10] sm:$0xff]  ;;  %v3283_v27 = vpack.c.bf16 %v2432_v25, %v2431_v23 }
 0x462   : > { %v3286_v29 = vpack.c.bf16 %v2434_v28, %v2433_v26 }
 0x464   : > { %3245 = vmatpush3.bf16.msra.mxu1 %v3244_v33  ;;  %3225 = vmatpush1.bf16.msra.mxu0 %v3224_v34  ;;  %v2437_v33 = vld [vmem:[#allocation21 + $0x30] sm:$0xff]  ;;  %v2438_v34 = vld [vmem:[#allocation21 + $0x38] sm:$0xff] }
 0x465   : > { %3247 = vmatprep.subr.bf16.mxu1 %v3246_v35  ;;  %3258 = vmatprep.subr.bf16.mxu0 %v3770_v54  ;;  %v3292_v35 = vpack.c.bf16 %v2438_v34, %v2437_v33 }
 0x467   : > { %2211 = vmatmul.mubr.f32.vlgmr.msra.gmra.mrb[0].mxu0 %v4201_v10  ;;  %v2337_v10 = vld [vmem:[#allocation19 + $0x10] sm:$0xff] }
 0x468   : > { %3249 = vmatpush3.bf16.msra.mxu1 %v3248_v39  ;;  %3260 = vmatpush3.bf16.msra.mxu0 %v3259_v55  ;;  %v3262_v57 = vpack.c.bf16 %v2338_v56, %v2337_v10  ;;  %v2441_v39 = vld [vmem:[#allocation21 + $0x50] sm:$0xff]  ;;  %v3304_v10 = vpack.c.bf16 %v2446_v53, %v2445_v52 }
 0x469   : > { %3251 = vmatprep.subr.bf16.mxu1 %v3250_v42  ;;  %3261 = vmatprep.subr.bf16.mxu0 %v3770_v54  ;;  %v3298_v41 = vpack.c.bf16 %v2442_v40, %v2441_v39  ;;  %v2443_v42 = vld [vmem:[#allocation21 + $0x60] sm:$0xff] }
 0x46a   : > { %2772 = vmatprep.mubr.msk.f32.mxu0 %vm3771_vm2, %v3769_v18  ;;  %v3301_v44 = vpack.c.bf16 %v2444_v43, %v2443_v42 }
 0x46c   : > { %3253 = vmatpush3.bf16.msra.mxu1 %v3252_v45  ;;  %3263 = vmatpush3.bf16.msra.mxu0 %v3262_v57 }
 0x46d   : > { %3255 = vmatprep.subr.bf16.mxu1 %v3254_v48  ;;  %3264 = vmatprep.subr.bf16.mxu0 %v3770_v54 }
 0x470   : > { %3257 = vmatpush3.bf16.msra.mxu1 %v3256_v51  ;;  %3266 = vmatpush3.bf16.msra.mxu0 %v3265_v60  ;;  %v2668_v60 = vld [vmem:[%s4407_s18] ss:$0 sm:$0xff] }
 0x471   : > { %3282 = vmatprep.subr.bf16.mxu1 %v3770_v54  ;;  %3267 = vmatprep.subr.bf16.mxu0 %v3770_v54 }
 0x474   : > { %3269 = vmatpush3.bf16.msra.mxu0 %v3268_v63 }
 0x475   : > { %3270 = vmatprep.subr.bf16.mxu0 %v3770_v54 }
 0x478   : > { %3272 = vmatpush3.bf16.msra.mxu0 %v3271_v1 }
 0x479   : > { %3273 = vmatprep.subr.bf16.mxu0 %v3770_v54 }
 0x47c   : > { %3275 = vmatpush3.bf16.msra.mxu0 %v3274_v4 }
 0x47d   : > { %3276 = vmatprep.subr.bf16.mxu0 %v3770_v54 }
 0x480   : > { %3278 = vmatpush3.bf16.msra.mxu0 %v3277_v20 }
 0x481   : > { %3279 = vmatprep.subr.bf16.mxu0 %v3770_v54 }
 0x484   : > { %3281 = vmatpush3.bf16.msra.mxu0 %v3280_v22 }
 0x53a   : > { %v2212_v7 = vpop.f32.mrb[0].mxu0 }
 0x53b   : > { %v2213_v37 = vadd.f32 %v2212_v7, %v2139_v5  ;;  %v2214_v9 = vpop.f32.mrb[1].mxu0 }
 0x53c   : > { %v2215_v11 = vadd.f32 %v2214_v9, %v2143_v6 }
 0x53d   : > { %v2219_v12 = vmul.f32 0.01, %v2213_v37  ;;  %vm2217_vm1 = vcmp.ge.f32.partialorder %v2213_v37, 0.0 }
 0x53e   : > { %vm2218_vm0 = vcmp.ge.f32.partialorder %v2215_v11, 0.0  ;;  %v2220_v13 = vmul.f32 0.01, %v2215_v11 }
 0x53f   : > { %v2221_v15 = vsel %vm2217_vm1, %v2213_v37, %v2219_v12 }
 0x540   : > { %v2222_v14 = vsel %vm2218_vm0, %v2215_v11, %v2220_v13 }
 0x541   : > { %2326 = vmatprep.mubr.f32.mxu1 %v2222_v14 }
 0x542   : > { %2327 = vmatmul.mubr.f32.vlgmr.msra.gmra.mrb[0].mxu1 %v2221_v15 }
 0x543   : > { %2807 = vmatprep.mubr.msk.f32.mxu1 %vm3771_vm2, %v3769_v18  ;;  %3284 = vmatpush3.bf16.msra.mxu1 %v3283_v27  ;;  %v2439_v18 = vld [vmem:[#allocation21 + $0x40] sm:$0xff] }
 0x544   : > { %3285 = vmatprep.subr.bf16.mxu1 %v3770_v54  ;;  %v3295_v38 = vpack.c.bf16 %v2440_v36, %v2439_v18 }
 0x547   : > { %3287 = vmatpush3.bf16.msra.mxu1 %v3286_v29 }
 0x548   : > { %3288 = vmatprep.subr.bf16.mxu1 %v3770_v54 }
 0x54b   : > { %3290 = vmatpush3.bf16.msra.mxu1 %v3289_v32 }
 0x54c   : > { %3291 = vmatprep.subr.bf16.mxu1 %v3770_v54 }
 0x54f   : > { %3293 = vmatpush3.bf16.msra.mxu1 %v3292_v35 }
 0x550   : > { %3294 = vmatprep.subr.bf16.mxu1 %v3770_v54 }
 0x553   : > { %3296 = vmatpush3.bf16.msra.mxu1 %v3295_v38 }
 0x554   : > { %3297 = vmatprep.subr.bf16.mxu1 %v3770_v54 }
 0x557   : > { %3299 = vmatpush3.bf16.msra.mxu1 %v3298_v41 }
 0x558   : > { %3300 = vmatprep.subr.bf16.mxu1 %v3770_v54 }
 0x55b   : > { %3302 = vmatpush3.bf16.msra.mxu1 %v3301_v44 }
 0x55c   : > { %3303 = vmatprep.subr.bf16.mxu1 %v3770_v54  ;;  %v2667_v54 = vld [vmem:[%s4406_s2] ss:$0 sm:$0xff] }
 0x55f   : > { %3305 = vmatpush3.bf16.msra.mxu1 %v3304_v10 }
 0x615   : > { %v2703_v45 = vpop.f32.mrb[0].mxu1 }
 0x616   : > { %v2704_v47 = vpop.f32.mrb[1].mxu1 }
 0x617   : > { %v2705_v48 = vadd.f32 %v2704_v47, %v2703_v45 }
 0x619   : > { %v2329_v49 = vadd.f32 %v2705_v48, %v2666_v46 }
 0x61b   : > { %v2333_v50 = vmul.f32 0.01, %v2329_v49  ;;  %vm2332_vm3 = vcmp.ge.f32.partialorder %v2329_v49, 0.0 }
 0x61d   : > { %v2334_v51 = vsel %vm2332_vm3, %v2329_v49, %v2333_v50 }
 0x61e   : > { %2773 = vmatmul.mubr.f32.vlgmr.msra.gmra.mrb[2].mxu0 %v2334_v51 }
 0x6f1   : > { %v2424_v55 = vpop.f32.mrb[2].mxu0 }
 0x6f2   : > { %v2425_v56 = vadd.f32 %v2667_v54, %v2424_v55  ;;  %v2774_v57 = vpop.f32.mrb[3].mxu0 }
 0x6f4   : > { %vm2428_vm4 = vcmp.ge.f32.partialorder %v2425_v56, 0.0  ;;  %v2429_v58 = vmul.f32 0.01, %v2425_v56 }
 0x6f6   : > { %v2430_v59 = vsel %vm2428_vm4, %v2425_v56, %v2429_v58 }
 0x6f7   : > { %2808 = vmatmul.mubr.f32.vlgmr.msra.gmra.mrb[2].mxu1 %v2430_v59 }
 0x7ca   : > { %v2520_v61 = vpop.f32.mrb[2].mxu1 }
 0x7cb   : > { %v2521_v62 = vadd.f32 %v2668_v60, %v2520_v61  ;;  %v2809_v63 = vpop.f32.mrb[3].mxu1 }
 0x7cd   : > { %2524 = vst [vmem:[%s4408_s29] sm:$0xff] %v2521_v62 }
 0x7ce PF: > { %s4409_s20 = sld [smem:[#allocation27_spill]] }
 0x7d4   : > { %s33_s27 = sadd.s32 1, %s4409_s20  }
 0x7d5   : > { %p30_p3 = scmp.ge.s32.totalorder %s33_s27, 10  }
 0x7d7   :  { %32 = sbr.rel (!%p30_p3) target bundleno = 14 (0xe), region = 163 }
 0x7de   :  { %2536 = vsyncpa [#allocation9], 1 }
 0x7df   :  { %2538 = vsyncpa [#allocation9 + $0x1], 1 }
 0x7e0   :  { %2539 = vsyncpa [#allocation11], 1 }
 0x7e1   :  { %2540 = vsyncpa [#allocation14], 1 }
 0x7e2   :  { %2541 = vsyncpa [#allocation17], 1 }
 0x7e3   :  { %2542 = vsyncpa [#allocation20], 1 }

</bundles_post_ra>
